<compile_context>
chip_gen: v7x
topology: tpu7x:2x2x1
jax: 0.10.0
libtpu: 0.0.40
codegen_flags: <defaults>
</compile_context>

<pallas_src>
import functools

import jax
import jax.numpy as jnp
from jax import lax
from jax.experimental import pallas as pl
from jax.experimental.pallas import tpu as pltpu


def birnn_kernel(emb_ref, len_ref, wih_ref, b_ref, whh_ref,
                 w1_ref, b1_ref, w2_ref, b2_ref,
                 hn_ref, out_ref, xg_scr):
    T, BB, E = emb_ref.shape
    H2 = whh_ref.shape[0]      # 2 * hidden (stacked fwd|bwd state width)
    G = whh_ref.shape[1]       # 8 * hidden (all gates, both directions)
    H = H2 // 2

    # ---- one well-shaped bf16 input projection, hoisted out of the recurrence ----
    # (T*BB, E) @ (E, 8H) + bias, covering both directions and all four gates.
    emb2d = emb_ref[...].reshape(T * BB, E)
    xproj = (jnp.dot(emb2d, wih_ref[...],
                     preferred_element_type=jnp.float32) + b_ref[...])
    xg_scr[...] = xproj.reshape(T, BB, G)

    # Hoisted lane-class constants (never re-broadcast inside the loops).
    col = lax.broadcasted_iota(jnp.int32, (BB, G), 1)
    fwd_cols = (col % H2) < H                          # lanes fed from time t (forward dir)
    is_g = (col >= 2 * H2) & (col < 3 * H2)            # "g" gate lanes
    g_scale = jnp.where(is_g, 2.0, 1.0).astype(jnp.float32)
    g_off = jnp.where(is_g, -1.0, 0.0).astype(jnp.float32)

    # ---- pre-merge fwd/bwd time axes (off the latency-critical recurrence) ----
    # After this pass: xg_scr[t] = [xproj(t) on fwd lanes | xproj(T-1-t) on bwd lanes].
    @pl.loop(0, T // 2)
    def _(t):
        a = xg_scr[t]
        b = xg_scr[T - 1 - t]
        xg_scr[t] = jnp.where(fwd_cols, a, b)
        xg_scr[T - 1 - t] = jnp.where(fwd_cols, b, a)

    whh = whh_ref[...]                                  # (2H, 8H) bf16, block-diagonal
    len_b = len_ref[...]                                # (BB, 1) int32

    # Per-lane valid step window [lo, hi] (hoisted):
    #   forward lanes : active for t in [0, L-1]
    #   backward lanes: active for t in [T-L, T-1]  (i.e. time T-1-t in [0, L-1])
    col_s = lax.broadcasted_iota(jnp.int32, (BB, H2), 1)
    fwd_state = col_s < H
    lo = jnp.where(fwd_state, 0, T - len_b)
    hi = jnp.where(fwd_state, len_b - 1, T - 1)

    zeros = jnp.zeros((BB, H2), jnp.float32)

    def step(t, carry):
        h, c = carry                                    # (BB, 2H) = [h_f|h_b], [c_f|c_b]
        gates = xg_scr[t] + jnp.dot(h.astype(jnp.bfloat16), whh,
                                    preferred_element_type=jnp.float32)   # (BB, 8H)
        # Single full-width sigmoid; g lanes become tanh via 2*sigmoid(2x)-1
        # (the factor 2 is folded into the weights in the wrapper).
        sig = jax.nn.sigmoid(gates)
        act = sig * g_scale + g_off
        i_g = act[:, 0:H2]
        f_g = act[:, H2:2 * H2]
        g_g = act[:, 2 * H2:3 * H2]
        o_g = act[:, 3 * H2:4 * H2]
        c_new = f_g * c + i_g * g_g
        h_new = o_g * jnp.tanh(c_new)
        # pack_padded_sequence semantics: freeze state outside each lane's window.
        m = (t >= lo) & (t <= hi)
        return jnp.where(m, h_new, h), jnp.where(m, c_new, c)

    h_fin, _ = lax.fori_loop(0, T, step, (zeros, zeros),
                             unroll=True if T <= 16 else 4)

    # h_n = cat(forward_final, backward_final): already stacked -> single store.
    hn_ref[...] = h_fin

    # MLP head: Linear(2H -> 8) + ReLU, Linear(8 -> 2), LogSoftmax(dim=-1)
    hid = jnp.dot(h_fin, w1_ref[...], preferred_element_type=jnp.float32) + b1_ref[...]
    hid = jnp.maximum(hid, 0.0)
    logits = jnp.dot(hid, w2_ref[...], preferred_element_type=jnp.float32) + b2_ref[...]
    mx = jnp.max(logits, axis=-1, keepdims=True)
    lse = mx + jnp.log(jnp.sum(jnp.exp(logits - mx), axis=-1, keepdims=True))
    out_ref[...] = logits - lse


def _interleave_gate_cols(a_f, a_b, H):
    """(..., 4H) fwd / (..., 4H) bwd -> (..., 8H) gate-major, direction-minor:
    [i_f, i_b, f_f, f_b, g_f, g_b, o_f, o_b]."""
    lead = a_f.shape[:-1]
    af = a_f.reshape(*lead, 4, H)
    ab = a_b.reshape(*lead, 4, H)
    return jnp.stack([af, ab], axis=-2).reshape(*lead, 8 * H)


def _pick_block_b(B):
    """Big batch tiles (MXU M dim), but keep >=2 grid blocks when possible (v7x megacore)."""
    bp16 = -(-B // 16) * 16          # bf16 sublane-pack friendly
    if bp16 >= 256:
        return 128
    if bp16 >= 32:
        blk = (bp16 // 2 // 16) * 16
        return max(16, blk)
    return bp16


def birnn_forward(sequences, lengths, params, *, block_b=None):
    """sequences: (B, T) int32 token ids; lengths: (B,) int32 valid lengths."""
    B, T = sequences.shape
    emb_table = params["emb"]                      # (V, E), padding row zeroed
    E = emb_table.shape[1]
    H = params["whh_f"].shape[0]
    H2, G = 2 * H, 8 * H

    if block_b is None:
        block_b = _pick_block_b(B)

    # ---- glue (plain JAX): pad batch, embedding lookup, fused weights ----
    Bp = -(-B // block_b) * block_b
    pad_b = Bp - B
    if pad_b:
        sequences = jnp.concatenate(
            [sequences, jnp.zeros((pad_b, T), sequences.dtype)], axis=0)
        lengths = jnp.concatenate(
            [lengths, jnp.zeros((pad_b,), lengths.dtype)], axis=0)

    # TODO(synk): for small vocabularies, move this gather into the kernel (VMEM-resident
    # table + scalar-prefetched token ids) to skip one HBM round trip of the (B,T,E) slab.
    embs = jnp.take(emb_table, sequences, axis=0)              # (Bp, T, E)
    embs_tm = jnp.transpose(embs, (1, 0, 2)).astype(jnp.bfloat16)   # (T, Bp, E) time-major
    lengths_2d = lengths.reshape(Bp, 1).astype(jnp.int32)

    # Fused weights (gate-major / direction-minor column order).
    wih = _interleave_gate_cols(params["wih_f"], params["wih_b"], H)   # (E, 8H)
    bias = _interleave_gate_cols(params["b_f"], params["b_b"], H)      # (1, 8H)
    zer = jnp.zeros_like(params["whh_f"])
    # TODO(synk): at production H >= 128, split into two direction-specific (H,4H) dots
    # instead of this block-diagonal (2H,8H) matrix (halves per-step MXU MACs).
    whh = jnp.concatenate(
        [_interleave_gate_cols(params["whh_f"], zer, H),               # rows for h_f
         _interleave_gate_cols(zer, params["whh_b"], H)], axis=0)      # rows for h_b

    # tanh(x) = 2*sigmoid(2x) - 1: pre-scale the g-gate columns (lanes [4H, 6H)) by 2
    # so the kernel evaluates only one full-width sigmoid per recurrence step.
    colg = jnp.arange(G)
    gmul = jnp.where((colg >= 4 * H) & (colg < 6 * H), 2.0, 1.0).astype(jnp.float32)
    wih = (wih * gmul).astype(jnp.bfloat16)
    whh = (whh * gmul).astype(jnp.bfloat16)
    bias = (bias * gmul).astype(jnp.float32)

    # VMEM budget for this tiling (double-buffered emb block + resident weights + scratch).
    # TODO(synk): for production T, stream the time axis (emit_pipeline / manual DMA from
    # pl.ANY) so the (T, block_b, 8H) scratch is T-independent (v7x has 64 MiB VMEM).
    bytes_needed = (2 * T * block_b * E * 2          # emb block, bf16, double buffered
                    + T * block_b * G * 4            # xg scratch, f32
                    + (E + H2) * G * 2 + G * 4       # fused weights + bias
                    + block_b * (H2 + 2) * 4 * 2     # outputs (double buffered)
                    + (4 << 20))                     # slack
    vmem_limit = int(min(max(bytes_needed, 32 << 20), 64 << 20))

    nb = Bp // block_b
    h_n, out = pl.pallas_call(
        birnn_kernel,
        grid=(nb,),
        in_specs=[
            pl.BlockSpec((T, block_b, E), lambda i: (0, i, 0)),
            pl.BlockSpec((block_b, 1), lambda i: (i, 0)),
            pl.BlockSpec((E, G), lambda i: (0, 0)),
            pl.BlockSpec((1, G), lambda i: (0, 0)),
            pl.BlockSpec((H2, G), lambda i: (0, 0)),
            pl.BlockSpec((H2, 8), lambda i: (0, 0)),
            pl.BlockSpec((1, 8), lambda i: (0, 0)),
            pl.BlockSpec((8, 2), lambda i: (0, 0)),
            pl.BlockSpec((1, 2), lambda i: (0, 0)),
        ],
        out_specs=(
            pl.BlockSpec((block_b, H2), lambda i: (i, 0)),
            pl.BlockSpec((block_b, 2), lambda i: (i, 0)),
        ),
        out_shape=(
            jax.ShapeDtypeStruct((Bp, H2), jnp.float32),   # h_n
            jax.ShapeDtypeStruct((Bp, 2), jnp.float32),    # log-softmax output
        ),
        scratch_shapes=[pltpu.VMEM((T, block_b, G), jnp.float32)],
        compiler_params=pltpu.CompilerParams(
            dimension_semantics=("parallel",),
            vmem_limit_bytes=vmem_limit),
    )(embs_tm, lengths_2d, wih, bias, whh,
      params["w1"], params["b1"], params["w2"], params["b2"])
    return h_n[:B], out[:B]


def init_params(key, vocab_count, pad_token, emb_dim, hidden_size):
    ks = jax.random.split(key, 12)
    H, E = hidden_size, emb_dim
    scale = 0.1

    emb = scale * jax.random.normal(ks[0], (vocab_count, E), jnp.float32)
    emb = emb.at[pad_token].set(0.0)   # padding_idx row is zero, like nn.Embedding

    def lin(k, shape):
        return scale * jax.random.normal(k, shape, jnp.float32)

    params = {
        "emb": emb,
        # LSTM weights, pre-transposed: (E, 4H) / (H, 4H); PyTorch gate order i,f,g,o;
        # biases combined (b_ih + b_hh).
        "wih_f": lin(ks[1], (E, 4 * H)),
        "whh_f": lin(ks[2], (H, 4 * H)),
        "b_f": lin(ks[3], (1, 4 * H)) + lin(ks[4], (1, 4 * H)),
        "wih_b": lin(ks[5], (E, 4 * H)),
        "whh_b": lin(ks[6], (H, 4 * H)),
        "b_b": lin(ks[7], (1, 4 * H)) + lin(ks[8], (1, 4 * H)),
        # Linear(2H -> 8) and Linear(8 -> 2), stored as (in, out)
        "w1": lin(ks[9], (2 * H, 8)),
        "b1": lin(ks[10], (1, 8)),
        "w2": lin(ks[11], (8, 2)),
        "b2": jnp.zeros((1, 2), jnp.float32),
    }
    return params


if __name__ == "__main__":
    key = jax.random.PRNGKey(0)
    k_param, k_seq = jax.random.split(key)

    B, T = 16, 8
    vocab_count, pad_token = 20, 0
    emb_dim, hidden_size = 16, 32

    params = init_params(k_param, vocab_count, pad_token, emb_dim, hidden_size)

    # lengths sorted descending, mimicking pack_padded_sequence(enforce_sorted=True)
    lengths = jnp.maximum(T - (jnp.arange(B) // 2), 1).astype(jnp.int32)
    sequences = jax.random.randint(k_seq, (B, T), 1, vocab_count, dtype=jnp.int32)
    # zero out (pad) positions beyond each sequence's length
    pad_mask = jnp.arange(T)[None, :] < lengths[:, None]
    sequences = jnp.where(pad_mask, sequences, pad_token)

    fwd = jax.jit(functools.partial(birnn_forward, params=params))
    h_n, out = fwd(sequences, lengths)
    jax.block_until_ready((h_n, out))

    assert h_n.shape == (B, 2 * hidden_size)
    assert out.shape == (B, 2)
    assert bool(jnp.all(jnp.isfinite(h_n))) and bool(jnp.all(jnp.isfinite(out)))
    print("KERNEL_OK")
</pallas_src>

<mosaic_0001>
module attributes {stable_mosaic.version = 11 : i64} {
  func.func @birnn_kernel(%arg0: i32, %arg1: memref<8x16x16xbf16, #tpu.memory_space<vmem>>, %arg2: memref<16x1xi32, #tpu.memory_space<vmem>>, %arg3: memref<16x256xbf16, #tpu.memory_space<vmem>>, %arg4: memref<1x256xf32, #tpu.memory_space<vmem>>, %arg5: memref<64x256xbf16, #tpu.memory_space<vmem>>, %arg6: memref<64x8xf32, #tpu.memory_space<vmem>>, %arg7: memref<1x8xf32, #tpu.memory_space<vmem>>, %arg8: memref<8x2xf32, #tpu.memory_space<vmem>>, %arg9: memref<1x2xf32, #tpu.memory_space<vmem>>, %arg10: memref<16x64xf32, #tpu.memory_space<vmem>>, %arg11: memref<16x2xf32, #tpu.memory_space<vmem>>, %arg12: memref<8x16x256xf32, #tpu.memory_space<vmem>>) attributes {dimension_semantics = [#tpu.dimension_semantics<parallel>], iteration_bounds = array<i64: 1>, scalar_prefetch = 0 : i64, scratch_operands = 1 : i64, tpu.core_type = #tpu.core_type<tc>, window_params = [{transform_indices = @transform_0, window_bounds = array<i64: 8, 16, 16>}, {transform_indices = @transform_1, window_bounds = array<i64: 16, 1>}, {pipeline_mode = #tpu.pipeline_mode<synchronous>, transform_indices = @transform_2, window_bounds = array<i64: 16, 256>}, {pipeline_mode = #tpu.pipeline_mode<synchronous>, transform_indices = @transform_3, window_bounds = array<i64: 1, 256>}, {pipeline_mode = #tpu.pipeline_mode<synchronous>, transform_indices = @transform_4, window_bounds = array<i64: 64, 256>}, {pipeline_mode = #tpu.pipeline_mode<synchronous>, transform_indices = @transform_5, window_bounds = array<i64: 64, 8>}, {pipeline_mode = #tpu.pipeline_mode<synchronous>, transform_indices = @transform_6, window_bounds = array<i64: 1, 8>}, {pipeline_mode = #tpu.pipeline_mode<synchronous>, transform_indices = @transform_7, window_bounds = array<i64: 8, 2>}, {pipeline_mode = #tpu.pipeline_mode<synchronous>, transform_indices = @transform_8, window_bounds = array<i64: 1, 2>}, {transform_indices = @transform_9, window_bounds = array<i64: 16, 64>}, {transform_indices = @transform_10, window_bounds = array<i64: 16, 2>}]} {
    %c0 = arith.constant 0 : index
    %c0_0 = arith.constant 0 : index
    %c0_1 = arith.constant 0 : index
    %0 = vector.load %arg1[%c0, %c0_0, %c0_1] : memref<8x16x16xbf16, #tpu.memory_space<vmem>>, vector<8x16x16xbf16>
    %1 = vector.shape_cast %0 : vector<8x16x16xbf16> to vector<128x16xbf16>
    %c0_2 = arith.constant 0 : index
    %c0_3 = arith.constant 0 : index
    %2 = vector.load %arg3[%c0_2, %c0_3] : memref<16x256xbf16, #tpu.memory_space<vmem>>, vector<16x256xbf16>
    %cst = arith.constant dense<0.000000e+00> : vector<128x256xf32>
    %3 = tpu.matmul %1, %2, %cst {dimension_numbers = #tpu.dot_dimension_numbers<[1], [0], [0], [1], [0, 0, 1, 1], [], []>} : vector<128x16xbf16>, vector<16x256xbf16>, vector<128x256xf32> -> vector<128x256xf32>
    %c0_4 = arith.constant 0 : index
    %c0_5 = arith.constant 0 : index
    %4 = vector.load %arg4[%c0_4, %c0_5] : memref<1x256xf32, #tpu.memory_space<vmem>>, vector<1x256xf32>
    %5 = vector.broadcast %4 : vector<1x256xf32> to vector<128x256xf32>
    %6 = arith.addf %3, %5 : vector<128x256xf32>
    %7 = vector.shape_cast %6 : vector<128x256xf32> to vector<8x16x256xf32>
    %c0_6 = arith.constant 0 : index
    %c0_7 = arith.constant 0 : index
    %c0_8 = arith.constant 0 : index
    %8 = vector.load %arg12[%c0_6, %c0_7, %c0_8] : memref<8x16x256xf32, #tpu.memory_space<vmem>>, vector<8x16x256xf32>
    tpu.vector_store %arg12[%c0_6, %c0_7, %c0_8], %7 {strides = array<i32>} : memref<8x16x256xf32, #tpu.memory_space<vmem>>, vector<8x16x256xf32>,
    %9 = tpu.iota {dimensions = array<i32: 1>} : vector<16x256xi32>
    %c64_i32 = arith.constant 64 : i32
    %c0_i32 = arith.constant 0 : i32
    %10 = arith.cmpi eq, %c64_i32, %c0_i32 : i32
    %c1_i32 = arith.constant 1 : i32
    %11 = arith.select %10, %c1_i32, %c64_i32 : i32
    %12 = vector.broadcast %11 : i32 to vector<16x256xi32>
    %13 = arith.remsi %9, %12 : vector<16x256xi32>
    %c0_i32_9 = arith.constant 0 : i32
    %14 = vector.broadcast %c0_i32_9 : i32 to vector<16x256xi32>
    %15 = arith.cmpi ne, %13, %14 : vector<16x256xi32>
    %c0_i32_10 = arith.constant 0 : i32
    %16 = vector.broadcast %c0_i32_10 : i32 to vector<16x256xi32>
    %17 = arith.cmpi slt, %13, %16 : vector<16x256xi32>
    %c0_i32_11 = arith.constant 0 : i32
    %18 = arith.cmpi slt, %11, %c0_i32_11 : i32
    %19 = vector.broadcast %18 : i1 to vector<16x256xi1>
    %20 = vector.broadcast %19 : vector<16x256xi1> to vector<16x256xi1>
    %21 = arith.xori %17, %20 : vector<16x256xi1>
    %22 = arith.andi %21, %15 : vector<16x256xi1>
    %23 = vector.broadcast %11 : i32 to vector<16x256xi32>
    %24 = arith.addi %13, %23 : vector<16x256xi32>
    %25 = arith.select %22, %24, %13 : vector<16x256xi1>, vector<16x256xi32>
    %c32_i32 = arith.constant 32 : i32
    %26 = vector.broadcast %c32_i32 : i32 to vector<16x256xi32>
    %27 = arith.cmpi slt, %25, %26 : vector<16x256xi32>
    %c128_i32 = arith.constant 128 : i32
    %28 = vector.broadcast %c128_i32 : i32 to vector<16x256xi32>
    %29 = arith.cmpi sge, %9, %28 : vector<16x256xi32>
    %c192_i32 = arith.constant 192 : i32
    %30 = vector.broadcast %c192_i32 : i32 to vector<16x256xi32>
    %31 = arith.cmpi slt, %9, %30 : vector<16x256xi32>
    %32 = arith.andi %29, %31 : vector<16x256xi1>
    %cst_12 = arith.constant 2.000000e+00 : f32
    %cst_13 = arith.constant 1.000000e+00 : f32
    %33 = vector.broadcast %cst_12 : f32 to vector<16x256xf32>
    %34 = vector.broadcast %cst_13 : f32 to vector<16x256xf32>
    %35 = arith.select %32, %33, %34 : vector<16x256xi1>, vector<16x256xf32>
    %cst_14 = arith.constant -1.000000e+00 : f32
    %cst_15 = arith.constant 0.000000e+00 : f32
    %36 = vector.broadcast %cst_14 : f32 to vector<16x256xf32>
    %37 = vector.broadcast %cst_15 : f32 to vector<16x256xf32>
    %38 = arith.select %32, %36, %37 : vector<16x256xi1>, vector<16x256xf32>
    %c0_i32_16 = arith.constant 0 : i32
    %c4_i32 = arith.constant 4 : i32
    %39 = arith.addi %c0_i32_16, %c4_i32 : i32
    %c1_i32_17 = arith.constant 1 : i32
    scf.for %arg13 = %c0_i32_16 to %39 step %c1_i32_17  : i32 {
      %c1_i32_81 = arith.constant 1 : i32
      %315 = arith.muli %arg13, %c1_i32_81 : i32
      %c0_i32_82 = arith.constant 0 : i32
      %316 = arith.addi %c0_i32_82, %315 : i32
      %317 = arith.index_cast %316 : i32 to index
      %c0_83 = arith.constant 0 : index
      %c0_84 = arith.constant 0 : index
      %318 = vector.load %arg12[%317, %c0_83, %c0_84] : memref<8x16x256xf32, #tpu.memory_space<vmem>>, vector<1x16x256xf32>
      %319 = vector.shape_cast %318 : vector<1x16x256xf32> to vector<16x256xf32>
      %c7_i32_85 = arith.constant 7 : i32
      %320 = arith.subi %c7_i32_85, %316 : i32
      %321 = arith.index_cast %320 : i32 to index
      %c0_86 = arith.constant 0 : index
      %c0_87 = arith.constant 0 : index
      %322 = vector.load %arg12[%321, %c0_86, %c0_87] : memref<8x16x256xf32, #tpu.memory_space<vmem>>, vector<1x16x256xf32>
      %323 = vector.shape_cast %322 : vector<1x16x256xf32> to vector<16x256xf32>
      %324 = arith.select %27, %319, %323 : vector<16x256xi1>, vector<16x256xf32>
      %325 = arith.index_cast %316 : i32 to index
      %c0_88 = arith.constant 0 : index
      %c0_89 = arith.constant 0 : index
      %326 = vector.load %arg12[%325, %c0_88, %c0_89] : memref<8x16x256xf32, #tpu.memory_space<vmem>>, vector<1x16x256xf32>
      %327 = vector.shape_cast %326 : vector<1x16x256xf32> to vector<16x256xf32>
      %328 = vector.shape_cast %324 : vector<16x256xf32> to vector<1x16x256xf32>
      tpu.vector_store %arg12[%325, %c0_88, %c0_89], %328 {strides = array<i32>} : memref<8x16x256xf32, #tpu.memory_space<vmem>>, vector<1x16x256xf32>,
      %329 = arith.select %27, %323, %319 : vector<16x256xi1>, vector<16x256xf32>
      %c7_i32_90 = arith.constant 7 : i32
      %330 = arith.subi %c7_i32_90, %316 : i32
      %331 = arith.index_cast %330 : i32 to index
      %c0_91 = arith.constant 0 : index
      %c0_92 = arith.constant 0 : index
      %332 = vector.load %arg12[%331, %c0_91, %c0_92] : memref<8x16x256xf32, #tpu.memory_space<vmem>>, vector<1x16x256xf32>
      %333 = vector.shape_cast %332 : vector<1x16x256xf32> to vector<16x256xf32>
      %334 = vector.shape_cast %329 : vector<16x256xf32> to vector<1x16x256xf32>
      tpu.vector_store %arg12[%331, %c0_91, %c0_92], %334 {strides = array<i32>} : memref<8x16x256xf32, #tpu.memory_space<vmem>>, vector<1x16x256xf32>,
    }
    %c4_i32_18 = arith.constant 4 : i32
    %c0_19 = arith.constant 0 : index
    %c0_20 = arith.constant 0 : index
    %40 = vector.load %arg5[%c0_19, %c0_20] : memref<64x256xbf16, #tpu.memory_space<vmem>>, vector<64x256xbf16>
    %c0_21 = arith.constant 0 : index
    %c0_22 = arith.constant 0 : index
    %41 = vector.load %arg2[%c0_21, %c0_22] : memref<16x1xi32, #tpu.memory_space<vmem>>, vector<16x1xi32>
    %42 = tpu.iota {dimensions = array<i32: 1>} : vector<16x64xi32>
    %c32_i32_23 = arith.constant 32 : i32
    %43 = vector.broadcast %c32_i32_23 : i32 to vector<16x64xi32>
    %44 = arith.cmpi slt, %42, %43 : vector<16x64xi32>
    %c8_i32 = arith.constant 8 : i32
    %45 = vector.broadcast %c8_i32 : i32 to vector<16x1xi32>
    %46 = arith.subi %45, %41 : vector<16x1xi32>
    %c0_i32_24 = arith.constant 0 : i32
    %47 = vector.broadcast %c0_i32_24 : i32 to vector<16x64xi32>
    %48 = vector.shape_cast %46 : vector<16x1xi32> to vector<16x1xi32>
    %49 = vector.broadcast %48 : vector<16x1xi32> to vector<16x64xi32>
    %50 = arith.select %44, %47, %49 : vector<16x64xi1>, vector<16x64xi32>
    %c1_i32_25 = arith.constant 1 : i32
    %51 = vector.broadcast %c1_i32_25 : i32 to vector<16x1xi32>
    %52 = arith.subi %41, %51 : vector<16x1xi32>
    %c7_i32 = arith.constant 7 : i32
    %53 = vector.shape_cast %52 : vector<16x1xi32> to vector<16x1xi32>
    %54 = vector.broadcast %53 : vector<16x1xi32> to vector<16x64xi32>
    %55 = vector.broadcast %c7_i32 : i32 to vector<16x64xi32>
    %56 = arith.select %44, %54, %55 : vector<16x64xi1>, vector<16x64xi32>
    %cst_26 = arith.constant 0.000000e+00 : f32
    %57 = vector.broadcast %cst_26 : f32 to vector<16x64xf32>
    %c0_i32_27 = arith.constant 0 : i32
    %58 = arith.index_cast %c0_i32_27 : i32 to index
    %c0_28 = arith.constant 0 : index
    %c0_29 = arith.constant 0 : index
    %59 = vector.load %arg12[%58, %c0_28, %c0_29] : memref<8x16x256xf32, #tpu.memory_space<vmem>>, vector<1x16x256xf32>
    %60 = vector.shape_cast %59 : vector<1x16x256xf32> to vector<16x256xf32>
    %61 = arith.truncf %57 : vector<16x64xf32> to vector<16x64xbf16>
    %cst_30 = arith.constant dense<0.000000e+00> : vector<16x256xf32>
    %62 = tpu.matmul %61, %40, %cst_30 {dimension_numbers = #tpu.dot_dimension_numbers<[1], [0], [0], [1], [0, 0, 1, 1], [], []>} : vector<16x64xbf16>, vector<64x256xbf16>, vector<16x256xf32> -> vector<16x256xf32>
    %63 = arith.addf %60, %62 : vector<16x256xf32>
    %64 = arith.negf %63 : vector<16x256xf32>
    %65 = math.exp %64 : vector<16x256xf32>
    %cst_31 = arith.constant 1.000000e+00 : f32
    %66 = vector.broadcast %cst_31 : f32 to vector<16x256xf32>
    %67 = arith.addf %66, %65 : vector<16x256xf32>
    %68 = arith.divf %66, %67 : vector<16x256xf32>
    %69 = arith.mulf %68, %35 : vector<16x256xf32>
    %70 = arith.addf %69, %38 : vector<16x256xf32>
    %71 = vector.extract_strided_slice %70 {offsets = [0, 0], sizes = [16, 64], strides = [1, 1]} : vector<16x256xf32> to vector<16x64xf32>
    %72 = vector.extract_strided_slice %70 {offsets = [0, 64], sizes = [16, 64], strides = [1, 1]} : vector<16x256xf32> to vector<16x64xf32>
    %73 = vector.extract_strided_slice %70 {offsets = [0, 128], sizes = [16, 64], strides = [1, 1]} : vector<16x256xf32> to vector<16x64xf32>
    %74 = vector.extract_strided_slice %70 {offsets = [0, 192], sizes = [16, 64], strides = [1, 1]} : vector<16x256xf32> to vector<16x64xf32>
    %75 = arith.mulf %72, %57 : vector<16x64xf32>
    %76 = arith.mulf %71, %73 : vector<16x64xf32>
    %77 = arith.addf %75, %76 : vector<16x64xf32>
    %78 = math.tanh %77 : vector<16x64xf32>
    %79 = arith.mulf %74, %78 : vector<16x64xf32>
    %80 = vector.broadcast %c0_i32_27 : i32 to vector<16x64xi32>
    %81 = arith.cmpi sge, %80, %50 : vector<16x64xi32>
    %82 = vector.broadcast %c0_i32_27 : i32 to vector<16x64xi32>
    %83 = arith.cmpi sle, %82, %56 : vector<16x64xi32>
    %84 = arith.andi %81, %83 : vector<16x64xi1>
    %85 = arith.select %84, %79, %57 : vector<16x64xi1>, vector<16x64xf32>
    %86 = arith.select %84, %77, %57 : vector<16x64xi1>, vector<16x64xf32>
    %c1_i32_32 = arith.constant 1 : i32
    %87 = arith.index_cast %c1_i32_32 : i32 to index
    %c0_33 = arith.constant 0 : index
    %c0_34 = arith.constant 0 : index
    %88 = vector.load %arg12[%87, %c0_33, %c0_34] : memref<8x16x256xf32, #tpu.memory_space<vmem>>, vector<1x16x256xf32>
    %89 = vector.shape_cast %88 : vector<1x16x256xf32> to vector<16x256xf32>
    %90 = arith.truncf %85 : vector<16x64xf32> to vector<16x64xbf16>
    %cst_35 = arith.constant dense<0.000000e+00> : vector<16x256xf32>
    %91 = tpu.matmul %90, %40, %cst_35 {dimension_numbers = #tpu.dot_dimension_numbers<[1], [0], [0], [1], [0, 0, 1, 1], [], []>} : vector<16x64xbf16>, vector<64x256xbf16>, vector<16x256xf32> -> vector<16x256xf32>
    %92 = arith.addf %89, %91 : vector<16x256xf32>
    %93 = arith.negf %92 : vector<16x256xf32>
    %94 = math.exp %93 : vector<16x256xf32>
    %cst_36 = arith.constant 1.000000e+00 : f32
    %95 = vector.broadcast %cst_36 : f32 to vector<16x256xf32>
    %96 = arith.addf %95, %94 : vector<16x256xf32>
    %97 = arith.divf %95, %96 : vector<16x256xf32>
    %98 = arith.mulf %97, %35 : vector<16x256xf32>
    %99 = arith.addf %98, %38 : vector<16x256xf32>
    %100 = vector.extract_strided_slice %99 {offsets = [0, 0], sizes = [16, 64], strides = [1, 1]} : vector<16x256xf32> to vector<16x64xf32>
    %101 = vector.extract_strided_slice %99 {offsets = [0, 64], sizes = [16, 64], strides = [1, 1]} : vector<16x256xf32> to vector<16x64xf32>
    %102 = vector.extract_strided_slice %99 {offsets = [0, 128], sizes = [16, 64], strides = [1, 1]} : vector<16x256xf32> to vector<16x64xf32>
    %103 = vector.extract_strided_slice %99 {offsets = [0, 192], sizes = [16, 64], strides = [1, 1]} : vector<16x256xf32> to vector<16x64xf32>
    %104 = arith.mulf %101, %86 : vector<16x64xf32>
    %105 = arith.mulf %100, %102 : vector<16x64xf32>
    %106 = arith.addf %104, %105 : vector<16x64xf32>
    %107 = math.tanh %106 : vector<16x64xf32>
    %108 = arith.mulf %103, %107 : vector<16x64xf32>
    %109 = vector.broadcast %c1_i32_32 : i32 to vector<16x64xi32>
    %110 = arith.cmpi sge, %109, %50 : vector<16x64xi32>
    %111 = vector.broadcast %c1_i32_32 : i32 to vector<16x64xi32>
    %112 = arith.cmpi sle, %111, %56 : vector<16x64xi32>
    %113 = arith.andi %110, %112 : vector<16x64xi1>
    %114 = arith.select %113, %108, %85 : vector<16x64xi1>, vector<16x64xf32>
    %115 = arith.select %113, %106, %86 : vector<16x64xi1>, vector<16x64xf32>
    %c2_i32 = arith.constant 2 : i32
    %116 = arith.index_cast %c2_i32 : i32 to index
    %c0_37 = arith.constant 0 : index
    %c0_38 = arith.constant 0 : index
    %117 = vector.load %arg12[%116, %c0_37, %c0_38] : memref<8x16x256xf32, #tpu.memory_space<vmem>>, vector<1x16x256xf32>
    %118 = vector.shape_cast %117 : vector<1x16x256xf32> to vector<16x256xf32>
    %119 = arith.truncf %114 : vector<16x64xf32> to vector<16x64xbf16>
    %cst_39 = arith.constant dense<0.000000e+00> : vector<16x256xf32>
    %120 = tpu.matmul %119, %40, %cst_39 {dimension_numbers = #tpu.dot_dimension_numbers<[1], [0], [0], [1], [0, 0, 1, 1], [], []>} : vector<16x64xbf16>, vector<64x256xbf16>, vector<16x256xf32> -> vector<16x256xf32>
    %121 = arith.addf %118, %120 : vector<16x256xf32>
    %122 = arith.negf %121 : vector<16x256xf32>
    %123 = math.exp %122 : vector<16x256xf32>
    %cst_40 = arith.constant 1.000000e+00 : f32
    %124 = vector.broadcast %cst_40 : f32 to vector<16x256xf32>
    %125 = arith.addf %124, %123 : vector<16x256xf32>
    %126 = arith.divf %124, %125 : vector<16x256xf32>
    %127 = arith.mulf %126, %35 : vector<16x256xf32>
    %128 = arith.addf %127, %38 : vector<16x256xf32>
    %129 = vector.extract_strided_slice %128 {offsets = [0, 0], sizes = [16, 64], strides = [1, 1]} : vector<16x256xf32> to vector<16x64xf32>
    %130 = vector.extract_strided_slice %128 {offsets = [0, 64], sizes = [16, 64], strides = [1, 1]} : vector<16x256xf32> to vector<16x64xf32>
    %131 = vector.extract_strided_slice %128 {offsets = [0, 128], sizes = [16, 64], strides = [1, 1]} : vector<16x256xf32> to vector<16x64xf32>
    %132 = vector.extract_strided_slice %128 {offsets = [0, 192], sizes = [16, 64], strides = [1, 1]} : vector<16x256xf32> to vector<16x64xf32>
    %133 = arith.mulf %130, %115 : vector<16x64xf32>
    %134 = arith.mulf %129, %131 : vector<16x64xf32>
    %135 = arith.addf %133, %134 : vector<16x64xf32>
    %136 = math.tanh %135 : vector<16x64xf32>
    %137 = arith.mulf %132, %136 : vector<16x64xf32>
    %138 = vector.broadcast %c2_i32 : i32 to vector<16x64xi32>
    %139 = arith.cmpi sge, %138, %50 : vector<16x64xi32>
    %140 = vector.broadcast %c2_i32 : i32 to vector<16x64xi32>
    %141 = arith.cmpi sle, %140, %56 : vector<16x64xi32>
    %142 = arith.andi %139, %141 : vector<16x64xi1>
    %143 = arith.select %142, %137, %114 : vector<16x64xi1>, vector<16x64xf32>
    %144 = arith.select %142, %135, %115 : vector<16x64xi1>, vector<16x64xf32>
    %c3_i32 = arith.constant 3 : i32
    %145 = arith.index_cast %c3_i32 : i32 to index
    %c0_41 = arith.constant 0 : index
    %c0_42 = arith.constant 0 : index
    %146 = vector.load %arg12[%145, %c0_41, %c0_42] : memref<8x16x256xf32, #tpu.memory_space<vmem>>, vector<1x16x256xf32>
    %147 = vector.shape_cast %146 : vector<1x16x256xf32> to vector<16x256xf32>
    %148 = arith.truncf %143 : vector<16x64xf32> to vector<16x64xbf16>
    %cst_43 = arith.constant dense<0.000000e+00> : vector<16x256xf32>
    %149 = tpu.matmul %148, %40, %cst_43 {dimension_numbers = #tpu.dot_dimension_numbers<[1], [0], [0], [1], [0, 0, 1, 1], [], []>} : vector<16x64xbf16>, vector<64x256xbf16>, vector<16x256xf32> -> vector<16x256xf32>
    %150 = arith.addf %147, %149 : vector<16x256xf32>
    %151 = arith.negf %150 : vector<16x256xf32>
    %152 = math.exp %151 : vector<16x256xf32>
    %cst_44 = arith.constant 1.000000e+00 : f32
    %153 = vector.broadcast %cst_44 : f32 to vector<16x256xf32>
    %154 = arith.addf %153, %152 : vector<16x256xf32>
    %155 = arith.divf %153, %154 : vector<16x256xf32>
    %156 = arith.mulf %155, %35 : vector<16x256xf32>
    %157 = arith.addf %156, %38 : vector<16x256xf32>
    %158 = vector.extract_strided_slice %157 {offsets = [0, 0], sizes = [16, 64], strides = [1, 1]} : vector<16x256xf32> to vector<16x64xf32>
    %159 = vector.extract_strided_slice %157 {offsets = [0, 64], sizes = [16, 64], strides = [1, 1]} : vector<16x256xf32> to vector<16x64xf32>
    %160 = vector.extract_strided_slice %157 {offsets = [0, 128], sizes = [16, 64], strides = [1, 1]} : vector<16x256xf32> to vector<16x64xf32>
    %161 = vector.extract_strided_slice %157 {offsets = [0, 192], sizes = [16, 64], strides = [1, 1]} : vector<16x256xf32> to vector<16x64xf32>
    %162 = arith.mulf %159, %144 : vector<16x64xf32>
    %163 = arith.mulf %158, %160 : vector<16x64xf32>
    %164 = arith.addf %162, %163 : vector<16x64xf32>
    %165 = math.tanh %164 : vector<16x64xf32>
    %166 = arith.mulf %161, %165 : vector<16x64xf32>
    %167 = vector.broadcast %c3_i32 : i32 to vector<16x64xi32>
    %168 = arith.cmpi sge, %167, %50 : vector<16x64xi32>
    %169 = vector.broadcast %c3_i32 : i32 to vector<16x64xi32>
    %170 = arith.cmpi sle, %169, %56 : vector<16x64xi32>
    %171 = arith.andi %168, %170 : vector<16x64xi1>
    %172 = arith.select %171, %166, %143 : vector<16x64xi1>, vector<16x64xf32>
    %173 = arith.select %171, %164, %144 : vector<16x64xi1>, vector<16x64xf32>
    %c4_i32_45 = arith.constant 4 : i32
    %174 = arith.index_cast %c4_i32_45 : i32 to index
    %c0_46 = arith.constant 0 : index
    %c0_47 = arith.constant 0 : index
    %175 = vector.load %arg12[%174, %c0_46, %c0_47] : memref<8x16x256xf32, #tpu.memory_space<vmem>>, vector<1x16x256xf32>
    %176 = vector.shape_cast %175 : vector<1x16x256xf32> to vector<16x256xf32>
    %177 = arith.truncf %172 : vector<16x64xf32> to vector<16x64xbf16>
    %cst_48 = arith.constant dense<0.000000e+00> : vector<16x256xf32>
    %178 = tpu.matmul %177, %40, %cst_48 {dimension_numbers = #tpu.dot_dimension_numbers<[1], [0], [0], [1], [0, 0, 1, 1], [], []>} : vector<16x64xbf16>, vector<64x256xbf16>, vector<16x256xf32> -> vector<16x256xf32>
    %179 = arith.addf %176, %178 : vector<16x256xf32>
    %180 = arith.negf %179 : vector<16x256xf32>
    %181 = math.exp %180 : vector<16x256xf32>
    %cst_49 = arith.constant 1.000000e+00 : f32
    %182 = vector.broadcast %cst_49 : f32 to vector<16x256xf32>
    %183 = arith.addf %182, %181 : vector<16x256xf32>
    %184 = arith.divf %182, %183 : vector<16x256xf32>
    %185 = arith.mulf %184, %35 : vector<16x256xf32>
    %186 = arith.addf %185, %38 : vector<16x256xf32>
    %187 = vector.extract_strided_slice %186 {offsets = [0, 0], sizes = [16, 64], strides = [1, 1]} : vector<16x256xf32> to vector<16x64xf32>
    %188 = vector.extract_strided_slice %186 {offsets = [0, 64], sizes = [16, 64], strides = [1, 1]} : vector<16x256xf32> to vector<16x64xf32>
    %189 = vector.extract_strided_slice %186 {offsets = [0, 128], sizes = [16, 64], strides = [1, 1]} : vector<16x256xf32> to vector<16x64xf32>
    %190 = vector.extract_strided_slice %186 {offsets = [0, 192], sizes = [16, 64], strides = [1, 1]} : vector<16x256xf32> to vector<16x64xf32>
    %191 = arith.mulf %188, %173 : vector<16x64xf32>
    %192 = arith.mulf %187, %189 : vector<16x64xf32>
    %193 = arith.addf %191, %192 : vector<16x64xf32>
    %194 = math.tanh %193 : vector<16x64xf32>
    %195 = arith.mulf %190, %194 : vector<16x64xf32>
    %196 = vector.broadcast %c4_i32_45 : i32 to vector<16x64xi32>
    %197 = arith.cmpi sge, %196, %50 : vector<16x64xi32>
    %198 = vector.broadcast %c4_i32_45 : i32 to vector<16x64xi32>
    %199 = arith.cmpi sle, %198, %56 : vector<16x64xi32>
    %200 = arith.andi %197, %199 : vector<16x64xi1>
    %201 = arith.select %200, %195, %172 : vector<16x64xi1>, vector<16x64xf32>
    %202 = arith.select %200, %193, %173 : vector<16x64xi1>, vector<16x64xf32>
    %c5_i32 = arith.constant 5 : i32
    %203 = arith.index_cast %c5_i32 : i32 to index
    %c0_50 = arith.constant 0 : index
    %c0_51 = arith.constant 0 : index
    %204 = vector.load %arg12[%203, %c0_50, %c0_51] : memref<8x16x256xf32, #tpu.memory_space<vmem>>, vector<1x16x256xf32>
    %205 = vector.shape_cast %204 : vector<1x16x256xf32> to vector<16x256xf32>
    %206 = arith.truncf %201 : vector<16x64xf32> to vector<16x64xbf16>
    %cst_52 = arith.constant dense<0.000000e+00> : vector<16x256xf32>
    %207 = tpu.matmul %206, %40, %cst_52 {dimension_numbers = #tpu.dot_dimension_numbers<[1], [0], [0], [1], [0, 0, 1, 1], [], []>} : vector<16x64xbf16>, vector<64x256xbf16>, vector<16x256xf32> -> vector<16x256xf32>
    %208 = arith.addf %205, %207 : vector<16x256xf32>
    %209 = arith.negf %208 : vector<16x256xf32>
    %210 = math.exp %209 : vector<16x256xf32>
    %cst_53 = arith.constant 1.000000e+00 : f32
    %211 = vector.broadcast %cst_53 : f32 to vector<16x256xf32>
    %212 = arith.addf %211, %210 : vector<16x256xf32>
    %213 = arith.divf %211, %212 : vector<16x256xf32>
    %214 = arith.mulf %213, %35 : vector<16x256xf32>
    %215 = arith.addf %214, %38 : vector<16x256xf32>
    %216 = vector.extract_strided_slice %215 {offsets = [0, 0], sizes = [16, 64], strides = [1, 1]} : vector<16x256xf32> to vector<16x64xf32>
    %217 = vector.extract_strided_slice %215 {offsets = [0, 64], sizes = [16, 64], strides = [1, 1]} : vector<16x256xf32> to vector<16x64xf32>
    %218 = vector.extract_strided_slice %215 {offsets = [0, 128], sizes = [16, 64], strides = [1, 1]} : vector<16x256xf32> to vector<16x64xf32>
    %219 = vector.extract_strided_slice %215 {offsets = [0, 192], sizes = [16, 64], strides = [1, 1]} : vector<16x256xf32> to vector<16x64xf32>
    %220 = arith.mulf %217, %202 : vector<16x64xf32>
    %221 = arith.mulf %216, %218 : vector<16x64xf32>
    %222 = arith.addf %220, %221 : vector<16x64xf32>
    %223 = math.tanh %222 : vector<16x64xf32>
    %224 = arith.mulf %219, %223 : vector<16x64xf32>
    %225 = vector.broadcast %c5_i32 : i32 to vector<16x64xi32>
    %226 = arith.cmpi sge, %225, %50 : vector<16x64xi32>
    %227 = vector.broadcast %c5_i32 : i32 to vector<16x64xi32>
    %228 = arith.cmpi sle, %227, %56 : vector<16x64xi32>
    %229 = arith.andi %226, %228 : vector<16x64xi1>
    %230 = arith.select %229, %224, %201 : vector<16x64xi1>, vector<16x64xf32>
    %231 = arith.select %229, %222, %202 : vector<16x64xi1>, vector<16x64xf32>
    %c6_i32 = arith.constant 6 : i32
    %232 = arith.index_cast %c6_i32 : i32 to index
    %c0_54 = arith.constant 0 : index
    %c0_55 = arith.constant 0 : index
    %233 = vector.load %arg12[%232, %c0_54, %c0_55] : memref<8x16x256xf32, #tpu.memory_space<vmem>>, vector<1x16x256xf32>
    %234 = vector.shape_cast %233 : vector<1x16x256xf32> to vector<16x256xf32>
    %235 = arith.truncf %230 : vector<16x64xf32> to vector<16x64xbf16>
    %cst_56 = arith.constant dense<0.000000e+00> : vector<16x256xf32>
    %236 = tpu.matmul %235, %40, %cst_56 {dimension_numbers = #tpu.dot_dimension_numbers<[1], [0], [0], [1], [0, 0, 1, 1], [], []>} : vector<16x64xbf16>, vector<64x256xbf16>, vector<16x256xf32> -> vector<16x256xf32>
    %237 = arith.addf %234, %236 : vector<16x256xf32>
    %238 = arith.negf %237 : vector<16x256xf32>
    %239 = math.exp %238 : vector<16x256xf32>
    %cst_57 = arith.constant 1.000000e+00 : f32
    %240 = vector.broadcast %cst_57 : f32 to vector<16x256xf32>
    %241 = arith.addf %240, %239 : vector<16x256xf32>
    %242 = arith.divf %240, %241 : vector<16x256xf32>
    %243 = arith.mulf %242, %35 : vector<16x256xf32>
    %244 = arith.addf %243, %38 : vector<16x256xf32>
    %245 = vector.extract_strided_slice %244 {offsets = [0, 0], sizes = [16, 64], strides = [1, 1]} : vector<16x256xf32> to vector<16x64xf32>
    %246 = vector.extract_strided_slice %244 {offsets = [0, 64], sizes = [16, 64], strides = [1, 1]} : vector<16x256xf32> to vector<16x64xf32>
    %247 = vector.extract_strided_slice %244 {offsets = [0, 128], sizes = [16, 64], strides = [1, 1]} : vector<16x256xf32> to vector<16x64xf32>
    %248 = vector.extract_strided_slice %244 {offsets = [0, 192], sizes = [16, 64], strides = [1, 1]} : vector<16x256xf32> to vector<16x64xf32>
    %249 = arith.mulf %246, %231 : vector<16x64xf32>
    %250 = arith.mulf %245, %247 : vector<16x64xf32>
    %251 = arith.addf %249, %250 : vector<16x64xf32>
    %252 = math.tanh %251 : vector<16x64xf32>
    %253 = arith.mulf %248, %252 : vector<16x64xf32>
    %254 = vector.broadcast %c6_i32 : i32 to vector<16x64xi32>
    %255 = arith.cmpi sge, %254, %50 : vector<16x64xi32>
    %256 = vector.broadcast %c6_i32 : i32 to vector<16x64xi32>
    %257 = arith.cmpi sle, %256, %56 : vector<16x64xi32>
    %258 = arith.andi %255, %257 : vector<16x64xi1>
    %259 = arith.select %258, %253, %230 : vector<16x64xi1>, vector<16x64xf32>
    %260 = arith.select %258, %251, %231 : vector<16x64xi1>, vector<16x64xf32>
    %c7_i32_58 = arith.constant 7 : i32
    %261 = arith.index_cast %c7_i32_58 : i32 to index
    %c0_59 = arith.constant 0 : index
    %c0_60 = arith.constant 0 : index
    %262 = vector.load %arg12[%261, %c0_59, %c0_60] : memref<8x16x256xf32, #tpu.memory_space<vmem>>, vector<1x16x256xf32>
    %263 = vector.shape_cast %262 : vector<1x16x256xf32> to vector<16x256xf32>
    %264 = arith.truncf %259 : vector<16x64xf32> to vector<16x64xbf16>
    %cst_61 = arith.constant dense<0.000000e+00> : vector<16x256xf32>
    %265 = tpu.matmul %264, %40, %cst_61 {dimension_numbers = #tpu.dot_dimension_numbers<[1], [0], [0], [1], [0, 0, 1, 1], [], []>} : vector<16x64xbf16>, vector<64x256xbf16>, vector<16x256xf32> -> vector<16x256xf32>
    %266 = arith.addf %263, %265 : vector<16x256xf32>
    %267 = arith.negf %266 : vector<16x256xf32>
    %268 = math.exp %267 : vector<16x256xf32>
    %cst_62 = arith.constant 1.000000e+00 : f32
    %269 = vector.broadcast %cst_62 : f32 to vector<16x256xf32>
    %270 = arith.addf %269, %268 : vector<16x256xf32>
    %271 = arith.divf %269, %270 : vector<16x256xf32>
    %272 = arith.mulf %271, %35 : vector<16x256xf32>
    %273 = arith.addf %272, %38 : vector<16x256xf32>
    %274 = vector.extract_strided_slice %273 {offsets = [0, 0], sizes = [16, 64], strides = [1, 1]} : vector<16x256xf32> to vector<16x64xf32>
    %275 = vector.extract_strided_slice %273 {offsets = [0, 64], sizes = [16, 64], strides = [1, 1]} : vector<16x256xf32> to vector<16x64xf32>
    %276 = vector.extract_strided_slice %273 {offsets = [0, 128], sizes = [16, 64], strides = [1, 1]} : vector<16x256xf32> to vector<16x64xf32>
    %277 = vector.extract_strided_slice %273 {offsets = [0, 192], sizes = [16, 64], strides = [1, 1]} : vector<16x256xf32> to vector<16x64xf32>
    %278 = arith.mulf %275, %260 : vector<16x64xf32>
    %279 = arith.mulf %274, %276 : vector<16x64xf32>
    %280 = arith.addf %278, %279 : vector<16x64xf32>
    %281 = math.tanh %280 : vector<16x64xf32>
    %282 = arith.mulf %277, %281 : vector<16x64xf32>
    %283 = vector.broadcast %c7_i32_58 : i32 to vector<16x64xi32>
    %284 = arith.cmpi sge, %283, %50 : vector<16x64xi32>
    %285 = vector.broadcast %c7_i32_58 : i32 to vector<16x64xi32>
    %286 = arith.cmpi sle, %285, %56 : vector<16x64xi32>
    %287 = arith.andi %284, %286 : vector<16x64xi1>
    %288 = arith.select %287, %282, %259 : vector<16x64xi1>, vector<16x64xf32>
    %289 = arith.select %287, %280, %260 : vector<16x64xi1>, vector<16x64xf32>
    %c8_i32_63 = arith.constant 8 : i32
    %c0_64 = arith.constant 0 : index
    %c0_65 = arith.constant 0 : index
    %290 = vector.load %arg10[%c0_64, %c0_65] : memref<16x64xf32, #tpu.memory_space<vmem>>, vector<16x64xf32>
    tpu.vector_store %arg10[%c0_64, %c0_65], %288 {strides = array<i32>} : memref<16x64xf32, #tpu.memory_space<vmem>>, vector<16x64xf32>,
    %c0_66 = arith.constant 0 : index
    %c0_67 = arith.constant 0 : index
    %291 = vector.load %arg6[%c0_66, %c0_67] : memref<64x8xf32, #tpu.memory_space<vmem>>, vector<64x8xf32>
    %cst_68 = arith.constant dense<0.000000e+00> : vector<16x8xf32>
    %292 = tpu.matmul %288, %291, %cst_68 {dimension_numbers = #tpu.dot_dimension_numbers<[1], [0], [0], [1], [0, 0, 1, 1], [], []>} : vector<16x64xf32>, vector<64x8xf32>, vector<16x8xf32> -> vector<16x8xf32>
    %c0_69 = arith.constant 0 : index
    %c0_70 = arith.constant 0 : index
    %293 = vector.load %arg7[%c0_69, %c0_70] : memref<1x8xf32, #tpu.memory_space<vmem>>, vector<1x8xf32>
    %294 = vector.broadcast %293 : vector<1x8xf32> to vector<16x8xf32>
    %295 = arith.addf %292, %294 : vector<16x8xf32>
    %cst_71 = arith.constant 0.000000e+00 : f32
    %296 = vector.broadcast %cst_71 : f32 to vector<16x8xf32>
    %297 = arith.maximumf %295, %296 : vector<16x8xf32>
    %c0_72 = arith.constant 0 : index
    %c0_73 = arith.constant 0 : index
    %298 = vector.load %arg8[%c0_72, %c0_73] : memref<8x2xf32, #tpu.memory_space<vmem>>, vector<8x2xf32>
    %cst_74 = arith.constant dense<0.000000e+00> : vector<16x2xf32>
    %299 = tpu.matmul %297, %298, %cst_74 {dimension_numbers = #tpu.dot_dimension_numbers<[1], [0], [0], [1], [0, 0, 1, 1], [], []>} : vector<16x8xf32>, vector<8x2xf32>, vector<16x2xf32> -> vector<16x2xf32>
    %c0_75 = arith.constant 0 : index
    %c0_76 = arith.constant 0 : index
    %300 = vector.load %arg9[%c0_75, %c0_76] : memref<1x2xf32, #tpu.memory_space<vmem>>, vector<1x2xf32>
    %301 = vector.broadcast %300 : vector<1x2xf32> to vector<16x2xf32>
    %302 = arith.addf %299, %301 : vector<16x2xf32>
    %cst_77 = arith.constant dense<0xFF800000> : vector<16xf32>
    %303 = vector.multi_reduction <maximumf>, %302, %cst_77 [1] : vector<16x2xf32> to vector<16xf32>
    %304 = vector.shape_cast %303 : vector<16xf32> to vector<16x1xf32>
    %305 = vector.broadcast %304 : vector<16x1xf32> to vector<16x2xf32>
    %306 = arith.subf %302, %305 : vector<16x2xf32>
    %307 = math.exp %306 : vector<16x2xf32>
    %cst_78 = arith.constant dense<0.000000e+00> : vector<16xf32>
    %308 = vector.multi_reduction <add>, %307, %cst_78 [1] : vector<16x2xf32> to vector<16xf32>
    %309 = vector.shape_cast %308 : vector<16xf32> to vector<16x1xf32>
    %310 = math.log %309 : vector<16x1xf32>
    %311 = arith.addf %304, %310 : vector<16x1xf32>
    %312 = vector.broadcast %311 : vector<16x1xf32> to vector<16x2xf32>
    %313 = arith.subf %302, %312 : vector<16x2xf32>
    %c0_79 = arith.constant 0 : index
    %c0_80 = arith.constant 0 : index
    %314 = vector.load %arg11[%c0_79, %c0_80] : memref<16x2xf32, #tpu.memory_space<vmem>>, vector<16x2xf32>
    tpu.vector_store %arg11[%c0_79, %c0_80], %313 {strides = array<i32>} : memref<16x2xf32, #tpu.memory_space<vmem>>, vector<16x2xf32>,
    return
  }
  func.func @transform_0(%arg0: i32) -> (i32, i32, i32) {
    %c0_i32 = arith.constant 0 : i32
    %c0_i32_0 = arith.constant 0 : i32
    %c0_i32_1 = arith.constant 0 : i32
    return %c0_i32, %arg0, %c0_i32_0 : i32, i32, i32
  }
  func.func @transform_1(%arg0: i32) -> (i32, i32) {
    %c0_i32 = arith.constant 0 : i32
    %c0_i32_0 = arith.constant 0 : i32
    return %arg0, %c0_i32 : i32, i32
  }
  func.func @transform_2(%arg0: i32) -> (i32, i32) {
    %c0_i32 = arith.constant 0 : i32
    %c0_i32_0 = arith.constant 0 : i32
    %c0_i32_1 = arith.constant 0 : i32
    return %c0_i32, %c0_i32_0 : i32, i32
  }
  func.func @transform_3(%arg0: i32) -> (i32, i32) {
    %c0_i32 = arith.constant 0 : i32
    %c0_i32_0 = arith.constant 0 : i32
    %c0_i32_1 = arith.constant 0 : i32
    return %c0_i32, %c0_i32_0 : i32, i32
  }
  func.func @transform_4(%arg0: i32) -> (i32, i32) {
    %c0_i32 = arith.constant 0 : i32
    %c0_i32_0 = arith.constant 0 : i32
    %c0_i32_1 = arith.constant 0 : i32
    return %c0_i32, %c0_i32_0 : i32, i32
  }
  func.func @transform_5(%arg0: i32) -> (i32, i32) {
    %c0_i32 = arith.constant 0 : i32
    %c0_i32_0 = arith.constant 0 : i32
    %c0_i32_1 = arith.constant 0 : i32
    return %c0_i32, %c0_i32_0 : i32, i32
  }
  func.func @transform_6(%arg0: i32) -> (i32, i32) {
    %c0_i32 = arith.constant 0 : i32
    %c0_i32_0 = arith.constant 0 : i32
    %c0_i32_1 = arith.constant 0 : i32
    return %c0_i32, %c0_i32_0 : i32, i32
  }
  func.func @transform_7(%arg0: i32) -> (i32, i32) {
    %c0_i32 = arith.constant 0 : i32
    %c0_i32_0 = arith.constant 0 : i32
    %c0_i32_1 = arith.constant 0 : i32
    return %c0_i32, %c0_i32_0 : i32, i32
  }
  func.func @transform_8(%arg0: i32) -> (i32, i32) {
    %c0_i32 = arith.constant 0 : i32
    %c0_i32_0 = arith.constant 0 : i32
    %c0_i32_1 = arith.constant 0 : i32
    return %c0_i32, %c0_i32_0 : i32, i32
  }
  func.func @transform_9(%arg0: i32) -> (i32, i32) {
    %c0_i32 = arith.constant 0 : i32
    %c0_i32_0 = arith.constant 0 : i32
    return %arg0, %c0_i32 : i32, i32
  }
  func.func @transform_10(%arg0: i32) -> (i32, i32) {
    %c0_i32 = arith.constant 0 : i32
    %c0_i32_0 = arith.constant 0 : i32
    return %arg0, %c0_i32 : i32, i32
  }
}

</mosaic_0001>

<bundles_post_ra>
// kernel: birnn_forward.1
= control target key start
LH: loop header
LB: loop body
LE: loop exit
PB: predicated region body
PF: predicated region fallthrough
CT: control target
= control target key end

     0   :  { %16 = vsyncpa [#allocation4], 0  ;;  %v2154_v2 = vmov 0   ;;  %vm116_vm0 = vcmask 130048   ;;  %v56_v11 = vlaneseq  ;;  %v2155_v18 = vmov 1.0   ;;  %s2811_s0 = inlined_call_operand.vmem [shape: bf16[8,16,16], index: 0, kind: input, shape index: {}]   ;;  %s2812_s1 = inlined_call_operand.vmem [shape: s32[16,1], index: 1, kind: input, shape index: {}]   ;;  %s2813_s2 = inlined_call_operand.vmem [shape: bf16[16,256], index: 2, kind: input, shape index: {}]   ;;  %s2814_s3 = inlined_call_operand.vmem [shape: f32[1,256], index: 3, kind: input, shape index: {}]   ;;  %s2815_s4 = inlined_call_operand.vmem [shape: bf16[64,256], index: 4, kind: input, shape index: {}]   ;;  %s2816_s5 = inlined_call_operand.vmem [shape: f32[64,8], index: 5, kind: input, shape index: {}]   ;;  %s2817_s6 = inlined_call_operand.vmem [shape: f32[1,8], index: 6, kind: input, shape index: {}]   ;;  %s2818_s7 = inlined_call_operand.vmem [shape: f32[8,2], index: 7, kind: input, shape index: {}]   ;;  %s2819_s8 = inlined_call_operand.vmem [shape: f32[1,2], index: 8, kind: input, shape index: {}]   ;;  %s2820_s9 = inlined_call_operand.hbm [shape: f32[16,64], index: 9, kind: output, shape index: {0}]   ;;  %s2821_s10 = inlined_call_operand.vmem [shape: f32[16,2], index: 10, kind: output, shape index: {1}]  }
   0x1   :  { %v1929_v0 = vld [vmem:[%s2813_s2 + $0x4] ss:$8 sps:$4 sm:$0xff]   ;;  %v1931_v1 = vld [vmem:[%s2813_s2] ss:$8 sps:$4 sm:$0xff]   ;;  %173 = vmatprep.mubr.bf16.mxu0 %v2154_v2  ;;  %v1934_v5 = vld [vmem:[%s2811_s0 + $0x10] sm:$0xff]   ;;  %v2156_v20 = vmov 0.0  }
   0x2   :  { %141 = vmatprep.subr.bf16.mxu0 %v1929_v0  ;;  %v1932_v3 = vld [vmem:[%s2811_s0] sm:$0xff]   ;;  %v1933_v4 = vld [vmem:[%s2811_s0 + $0x8] sm:$0xff]   ;;  %v1935_v6 = vld [vmem:[%s2811_s0 + $0x18] sm:$0xff]   ;;  %v2262_v12 = vand.u32 127, %v56_v11  ;;  %v57_v22 = vshrl.u32 %v56_v11, 7 }
   0x3   :  { %142 = vmatpush1.bf16.msra.mxu0 %v1931_v1  ;;  %v1936_v7 = vld [vmem:[%s2811_s0 + $0x20] sm:$0xff]   ;;  %v1937_v8 = vld [vmem:[%s2811_s0 + $0x28] sm:$0xff]   ;;  %v1938_v9 = vld [vmem:[%s2811_s0 + $0x30] sm:$0xff]  }
   0x4   :  { %v1939_v10 = vld [vmem:[%s2811_s0 + $0x38] sm:$0xff]   ;;  %v288_v13 = vadd.s32 128, %v2262_v12  ;;  %v293_v14 = vand.u32 63, %v2262_v12  ;;  %v58_v23 = vsub.s32 0, %v57_v22  ;;  %v54_v24 = vld [vmem:[%s2814_s3] sm:$0x3] }
   0x5   :  { %v62_v25 = vsub.s32 1, %v57_v22  ;;  %s2317_s3 = smov 0  }
   0x6   :  { %1792 = vmatmul.mubr.msk.bf16.vlgmr.msra.gmra.mrb[0].mxu0 %vm116_vm0, %v1932_v3  ;;  %v300_v15 = vand.u32 63, %v288_v13  ;;  %vm318_vm1 = vcmp.lt.s32.totalorder %v288_v13, 192  ;;  %vm2266_vm2 = vcmp.lt.s32.totalorder %v293_v14, 32  ;;  %v2281_v26 = vrot.slane %v54_v24, %v58_v23 }
   0x7   :  { %183 = vmatprep.mubr.bf16.mxu0 %v2154_v2  ;;  %v2274_v19 = vsel %vm318_vm1, 2.0, %v2155_v18  ;;  %v2276_v21 = vsel %vm318_vm1, -1.0, %v2156_v20  ;;  %v2283_v27 = vrot.slane %v54_v24, %v62_v25 }
   0x8   :  { %vm2270_vm3 = vcmp.lt.s32.totalorder %v300_v15, 32 }
   0xe   :  { %1793 = vmatmul.mubr.msk.bf16.gmra.mrb[4].mxu0 %vm116_vm0, %v1933_v4 }
   0xf   :  { %193 = vmatprep.mubr.bf16.mxu0 %v2154_v2 }
  0x16   :  { %1794 = vmatmul.mubr.msk.bf16.gmra.mrb[8].mxu0 %vm116_vm0, %v1934_v5 }
  0x17   :  { %203 = vmatprep.mubr.bf16.mxu0 %v2154_v2 }
  0x1e   :  { %1795 = vmatmul.mubr.msk.bf16.gmra.mrb[12].mxu0 %vm116_vm0, %v1935_v6 }
  0x1f   :  { %213 = vmatprep.mubr.bf16.mxu0 %v2154_v2 }
  0x26   :  { %1796 = vmatmul.mubr.msk.bf16.gmra.mrb[16].mxu0 %vm116_vm0, %v1936_v7 }
  0x27   :  { %223 = vmatprep.mubr.bf16.mxu0 %v2154_v2 }
  0x2e   :  { %1797 = vmatmul.mubr.msk.bf16.gmra.mrb[20].mxu0 %vm116_vm0, %v1937_v8 }
  0x2f   :  { %233 = vmatprep.mubr.bf16.mxu0 %v2154_v2 }
  0x36   :  { %1798 = vmatmul.mubr.msk.bf16.gmra.mrb[24].mxu0 %vm116_vm0, %v1938_v9 }
  0x37   :  { %243 = vmatprep.mubr.bf16.mxu0 %v2154_v2 }
  0x3e   :  { %1799 = vmatmul.mubr.msk.bf16.gmra.mrb[28].mxu0 %vm116_vm0, %v1939_v10 }
  0xd9   :  { %v175_v28 = vpop.f32.mrb[0].mxu0 }
  0xda   :  { %v176_v29 = vadd.f32 %v175_v28, %v2281_v26  ;;  %v177_v30 = vpop.f32.mrb[1].mxu0 }
  0xdb   :  { %v178_v31 = vadd.f32 %v177_v30, %v2283_v27  ;;  %v179_v32 = vpop.f32.mrb[2].mxu0 }
  0xdc   :  { %254 = vst [vmem:[#allocation2] sm:$0xff] %v176_v29  ;;  %v180_v33 = vadd.f32 %v179_v32, %v2281_v26  ;;  %v181_v34 = vpop.f32.mrb[3].mxu0 }
  0xdd   :  { %255 = vst [vmem:[#allocation2 + $0x8] sm:$0xff] %v178_v31  ;;  %v182_v35 = vadd.f32 %v181_v34, %v2283_v27 }
  0xde   :  { %256 = vst [vmem:[#allocation2 + $0x10] sm:$0xff] %v180_v33 }
  0xdf   :  { %257 = vst [vmem:[#allocation2 + $0x18] sm:$0xff] %v182_v35 }
  0xe1   :  { %v185_v36 = vpop.f32.mrb[4].mxu0 }
  0xe2   :  { %v186_v37 = vadd.f32 %v185_v36, %v2281_v26  ;;  %v187_v38 = vpop.f32.mrb[5].mxu0 }
  0xe3   :  { %v188_v39 = vadd.f32 %v187_v38, %v2283_v27  ;;  %v189_v40 = vpop.f32.mrb[6].mxu0 }
  0xe4   :  { %258 = vst [vmem:[#allocation2 + $0x20] sm:$0xff] %v186_v37  ;;  %v190_v41 = vadd.f32 %v189_v40, %v2281_v26  ;;  %v191_v42 = vpop.f32.mrb[7].mxu0 }
  0xe5   :  { %259 = vst [vmem:[#allocation2 + $0x28] sm:$0xff] %v188_v39  ;;  %v192_v43 = vadd.f32 %v191_v42, %v2283_v27 }
  0xe6   :  { %260 = vst [vmem:[#allocation2 + $0x30] sm:$0xff] %v190_v41 }
  0xe7   :  { %261 = vst [vmem:[#allocation2 + $0x38] sm:$0xff] %v192_v43 }
  0xe9   :  { %v195_v44 = vpop.f32.mrb[8].mxu0 }
  0xea   :  { %v196_v45 = vadd.f32 %v195_v44, %v2281_v26  ;;  %v197_v46 = vpop.f32.mrb[9].mxu0 }
  0xeb   :  { %v198_v47 = vadd.f32 %v197_v46, %v2283_v27  ;;  %v199_v48 = vpop.f32.mrb[10].mxu0 }
  0xec   :  { %262 = vst [vmem:[#allocation2 + $0x40] sm:$0xff] %v196_v45  ;;  %v200_v49 = vadd.f32 %v199_v48, %v2281_v26  ;;  %v201_v50 = vpop.f32.mrb[11].mxu0 }
  0xed   :  { %263 = vst [vmem:[#allocation2 + $0x48] sm:$0xff] %v198_v47  ;;  %v202_v51 = vadd.f32 %v201_v50, %v2283_v27 }
  0xee   :  { %264 = vst [vmem:[#allocation2 + $0x50] sm:$0xff] %v200_v49 }
  0xef   :  { %265 = vst [vmem:[#allocation2 + $0x58] sm:$0xff] %v202_v51 }
  0xf1   :  { %v205_v52 = vpop.f32.mrb[12].mxu0 }
  0xf2   :  { %v206_v53 = vadd.f32 %v205_v52, %v2281_v26  ;;  %v207_v54 = vpop.f32.mrb[13].mxu0 }
  0xf3   :  { %v208_v55 = vadd.f32 %v207_v54, %v2283_v27  ;;  %v209_v56 = vpop.f32.mrb[14].mxu0 }
  0xf4   :  { %266 = vst [vmem:[#allocation2 + $0x60] sm:$0xff] %v206_v53  ;;  %v210_v57 = vadd.f32 %v209_v56, %v2281_v26  ;;  %v211_v58 = vpop.f32.mrb[15].mxu0 }
  0xf5   :  { %267 = vst [vmem:[#allocation2 + $0x68] sm:$0xff] %v208_v55  ;;  %v212_v59 = vadd.f32 %v211_v58, %v2283_v27 }
  0xf6   :  { %268 = vst [vmem:[#allocation2 + $0x70] sm:$0xff] %v210_v57 }
  0xf7   :  { %269 = vst [vmem:[#allocation2 + $0x78] sm:$0xff] %v212_v59 }
  0xf9   :  { %v215_v60 = vpop.f32.mrb[16].mxu0 }
  0xfa   :  { %v216_v61 = vadd.f32 %v215_v60, %v2281_v26  ;;  %v217_v62 = vpop.f32.mrb[17].mxu0 }
  0xfb   :  { %v218_v63 = vadd.f32 %v217_v62, %v2283_v27  ;;  %v219_v0 = vpop.f32.mrb[18].mxu0 }
  0xfc   :  { %270 = vst [vmem:[#allocation2 + $0x80] sm:$0xff] %v216_v61  ;;  %v220_v1 = vadd.f32 %v219_v0, %v2281_v26  ;;  %v221_v3 = vpop.f32.mrb[19].mxu0 }
  0xfd   :  { %271 = vst [vmem:[#allocation2 + $0x88] sm:$0xff] %v218_v63  ;;  %v222_v4 = vadd.f32 %v221_v3, %v2283_v27 }
  0xfe   :  { %272 = vst [vmem:[#allocation2 + $0x90] sm:$0xff] %v220_v1 }
  0xff   :  { %273 = vst [vmem:[#allocation2 + $0x98] sm:$0xff] %v222_v4 }
 0x101   :  { %v225_v5 = vpop.f32.mrb[20].mxu0 }
 0x102   :  { %v226_v6 = vadd.f32 %v225_v5, %v2281_v26  ;;  %v227_v7 = vpop.f32.mrb[21].mxu0 }
 0x103   :  { %v228_v8 = vadd.f32 %v227_v7, %v2283_v27  ;;  %v229_v9 = vpop.f32.mrb[22].mxu0 }
 0x104   :  { %274 = vst [vmem:[#allocation2 + $0xa0] sm:$0xff] %v226_v6  ;;  %v230_v10 = vadd.f32 %v229_v9, %v2281_v26  ;;  %v231_v11 = vpop.f32.mrb[23].mxu0 }
 0x105   :  { %275 = vst [vmem:[#allocation2 + $0xa8] sm:$0xff] %v228_v8  ;;  %v232_v13 = vadd.f32 %v231_v11, %v2283_v27 }
 0x106   :  { %276 = vst [vmem:[#allocation2 + $0xb0] sm:$0xff] %v230_v10 }
 0x107   :  { %277 = vst [vmem:[#allocation2 + $0xb8] sm:$0xff] %v232_v13 }
 0x109   :  { %v235_v14 = vpop.f32.mrb[24].mxu0 }
 0x10a   :  { %v236_v15 = vadd.f32 %v235_v14, %v2281_v26  ;;  %v237_v18 = vpop.f32.mrb[25].mxu0 }
 0x10b   :  { %v238_v20 = vadd.f32 %v237_v18, %v2283_v27  ;;  %v239_v22 = vpop.f32.mrb[26].mxu0 }
 0x10c   :  { %278 = vst [vmem:[#allocation2 + $0xc0] sm:$0xff] %v236_v15  ;;  %v240_v23 = vadd.f32 %v239_v22, %v2281_v26  ;;  %v241_v24 = vpop.f32.mrb[27].mxu0 }
 0x10d   :  { %279 = vst [vmem:[#allocation2 + $0xc8] sm:$0xff] %v238_v20  ;;  %v242_v25 = vadd.f32 %v241_v24, %v2283_v27 }
 0x10e   :  { %280 = vst [vmem:[#allocation2 + $0xd0] sm:$0xff] %v240_v23 }
 0x10f   :  { %281 = vst [vmem:[#allocation2 + $0xd8] sm:$0xff] %v242_v25 }
 0x111   :  { %v245_v28 = vpop.f32.mrb[28].mxu0 }
 0x112   :  { %v246_v29 = vadd.f32 %v245_v28, %v2281_v26  ;;  %v247_v30 = vpop.f32.mrb[29].mxu0 }
 0x113   :  { %v248_v31 = vadd.f32 %v247_v30, %v2283_v27  ;;  %v249_v32 = vpop.f32.mrb[30].mxu0 }
 0x114   :  { %282 = vst [vmem:[#allocation2 + $0xe0] sm:$0xff] %v246_v29  ;;  %v250_v33 = vadd.f32 %v249_v32, %v2281_v26  ;;  %v251_v34 = vpop.f32.mrb[31].mxu0 }
 0x115   :  { %283 = vst [vmem:[#allocation2 + $0xe8] sm:$0xff] %v248_v31  ;;  %v252_v35 = vadd.f32 %v251_v34, %v2283_v27 }
 0x116   :  { %284 = vst [vmem:[#allocation2 + $0xf0] sm:$0xff] %v250_v33 }
 0x117   :  { %285 = vst [vmem:[#allocation2 + $0xf8] sm:$0xff] %v252_v35 }
 0x118 LB: > { %s1859_s13 = sshll.u32 %s2152_s3, 5  ;;  %s338_s14 = ssub.s32 7, %s2152_s3  ;;  %s2152_s3 = sphi %s2317_s3, %s330_s3  }
 0x119   : > { %s1860_s15 = sshll.u32 %s338_s14, 5  ;;  %s333_s16 = scalar_lea.vmem [#allocation2], %s1859_s13 }
 0x11a   : > { %s341_s17 = scalar_lea.vmem [#allocation2], %s1860_s15  ;;  %s330_s3 = sadd.s32 1, %s2152_s3  }
 0x11b   : > { %p327_p0 = scmp.ge.s32.totalorder %s330_s3, 4  }
 0x11c   :  { %v2346_v50 = vld [vmem:[%s2815_s4 + $0x4] ss:$8 sps:$4 sm:$0xff] (%p327_p0)   ;;  %473 = vmatprep.mubr.bf16.mxu1 (%p327_p0), %v2154_v2  ;;  %1940 = vset.pattern.permute.xlu1 (%p327_p0), %v2154_v2  ;;  %v2353_v51 = vld [vmem:[%s2815_s4] ss:$8 sps:$4 sm:$0xff] (%p327_p0)   ;;  %v2361_v16 = vld [vmem:[%s2815_s4 + $0x14] ss:$8 sps:$4 sm:$0xff] (%p327_p0)  }
 0x11d   :  { %1941 = vset.pattern.permute.xlu0 (%p327_p0), %v2154_v2  ;;  %1025 = vmatprep.mubr.bf16.mxu0 (%p327_p0), %v2154_v2  ;;  %v2368_v17 = vld [vmem:[%s2815_s4 + $0x10] ss:$8 sps:$4 sm:$0xff] (%p327_p0)   ;;  %v2375_v52 = vld [vmem:[%s2815_s4 + $0x24] ss:$8 sps:$4 sm:$0xff] (%p327_p0)   ;;  %v2382_v53 = vld [vmem:[%s2815_s4 + $0x20] ss:$8 sps:$4 sm:$0xff] (%p327_p0)  }
 0x11e   : > { %v334_v26 = vld [vmem:[%s333_s16] sm:$0xff]  ;;  %v335_v36 = vld [vmem:[%s333_s16 + $0x8] sm:$0xff]  ;;  %v336_v37 = vld [vmem:[%s333_s16 + $0x10] sm:$0xff]  ;;  %441 = vmatprep.subr.bf16.mxu1 (%p327_p0), %v2346_v50  ;;  %993 = vmatprep.subr.bf16.mxu0 (%p327_p0), %v2346_v50  ;;  %vm372_vm4 = vcmp.lt.s32.totalorder (%p327_p0), %v2262_v12, 32 }
 0x11f   : > { %v342_v27 = vld [vmem:[%s341_s17] sm:$0xff]  ;;  %v343_v38 = vld [vmem:[%s341_s17 + $0x8] sm:$0xff]  ;;  %v344_v39 = vld [vmem:[%s341_s17 + $0x10] sm:$0xff]  ;;  %329 = sbr.rel (!%p327_p0) target bundleno = 280 (0x118), region = 80  ;;  %442 = vmatpush1.bf16.msra.mxu1 (%p327_p0), %v2353_v51  ;;  %994 = vmatpush1.bf16.msra.mxu0 (%p327_p0), %v2353_v51 }
 0x120   : > { %v345_v40 = vld [vmem:[%s341_s17 + $0x18] sm:$0xff]  ;;  %v346_v41 = vsel %vm2266_vm2, %v334_v26, %v342_v27  ;;  %v347_v42 = vsel %vm2270_vm3, %v335_v36, %v343_v38  ;;  %v348_v43 = vsel %vm2266_vm2, %v336_v37, %v344_v39  ;;  %v354_v45 = vsel %vm2266_vm2, %v342_v27, %v334_v26  ;;  %443 = vmatprep.subr.bf16.mxu1 (%p327_p0), %v2361_v16  ;;  %v370_v56 = vld [vmem:[%s2812_s1] sm:$0xff] (%p327_p0)  ;;  %v371_v57 = vld [vmem:[%s2812_s1 + $0x8] sm:$0xff] (%p327_p0)  ;;  %s2157_s1 = smov (%p327_p0), 64  }
 0x121   : > { %v337_v44 = vld [vmem:[%s333_s16 + $0x18] sm:$0xff]  ;;  %350 = vst [vmem:[%s333_s16] sm:$0xff] %v346_v41  ;;  %351 = vst [vmem:[%s333_s16 + $0x8] sm:$0xff] %v347_v42  ;;  %v355_v47 = vsel %vm2270_vm3, %v343_v38, %v335_v36  ;;  %v356_v48 = vsel %vm2266_vm2, %v344_v39, %v336_v37  ;;  %995 = vmatprep.subr.bf16.mxu0 (%p327_p0), %v2361_v16  ;;  %v373_v58 = vsub.s32 (%p327_p0), 8, %v370_v56  ;;  %v374_v59 = vsub.s32 (%p327_p0), 8, %v371_v57 }
 0x122   : > { %352 = vst [vmem:[%s333_s16 + $0x10] sm:$0xff] %v348_v43  ;;  %v349_v46 = vsel %vm2270_vm3, %v337_v44, %v345_v40  ;;  %v357_v49 = vsel %vm2270_vm3, %v345_v40, %v337_v44  ;;  %v2389_v54 = vld [vmem:[%s2815_s4 + $0x34] ss:$8 sps:$4 sm:$0xff] (%p327_p0)   ;;  %v2396_v55 = vld [vmem:[%s2815_s4 + $0x30] ss:$8 sps:$4 sm:$0xff] (%p327_p0)   ;;  %v1805_v60 = vadd.s32 (%p327_p0), 4294967295, %v371_v57 }
 0x123   : > { %353 = vst [vmem:[%s333_s16 + $0x18] sm:$0xff] %v349_v46  ;;  %444 = vmatpush1.bf16.msra.mxu1 (%p327_p0), %v2368_v17  ;;  %996 = vmatpush1.bf16.msra.mxu0 (%p327_p0), %v2368_v17  ;;  %v1804_v27 = vadd.s32 (%p327_p0), 4294967295, %v370_v56 }
 0x124   : > { %358 = vst [vmem:[%s341_s17] sm:$0xff] %v354_v45  ;;  %359 = vst [vmem:[%s341_s17 + $0x8] sm:$0xff] %v355_v47  ;;  %445 = vmatprep.subr.bf16.mxu1 (%p327_p0), %v2375_v52  ;;  %997 = vmatprep.subr.bf16.mxu0 (%p327_p0), %v2375_v52 }
 0x125   : > { %360 = vst [vmem:[%s341_s17 + $0x10] sm:$0xff] %v356_v48  ;;  %361 = vst [vmem:[%s341_s17 + $0x18] sm:$0xff] %v357_v49  ;;  %376 = vperm.xlu1 (%p327_p0), %1940, %v373_v58  }
 0x127   :  { %446 = vmatpush1.bf16.msra.mxu1 %v2382_v53  ;;  %998 = vmatpush1.bf16.msra.mxu0 %v2382_v53 }
 0x128   :  { %447 = vmatprep.subr.bf16.mxu1 %v2389_v54  ;;  %999 = vmatprep.subr.bf16.mxu0 %v2389_v54 }
 0x129   :  { %379 = vperm.xlu1 %1940, %v374_v59  }
 0x12b   :  { %448 = vmatpush1.bf16.msra.mxu1 %v2396_v55  ;;  %1000 = vmatpush1.bf16.msra.mxu0 %v2396_v55 }
 0x12c   :  { %573 = vmatprep.subr.bf16.mxu1 %v2346_v50  ;;  %1273 = vmatprep.subr.bf16.mxu0 %v2346_v50  ;;  %v393_v61 = vld [vmem:[#allocation2] sm:$0xff]  ;;  %v394_v62 = vld [vmem:[#allocation2 + $0x8] sm:$0xff]  ;;  %v395_v0 = vld [vmem:[#allocation2 + $0x10] sm:$0xff] }
 0x12d   :  { %389 = vperm.xlu1 %1940, %v1805_v60   ;;  %v396_v4 = vld [vmem:[#allocation2 + $0x18] sm:$0xff]  ;;  %v705_v43 = vld [vmem:[#allocation2 + $0x40] sm:$0xff] }
 0x12e   :  { %474 = vmatmul.mubr.bf16.vlgmr.msra.gmra.mrb[0].mxu1 %v2154_v2  ;;  %v845_v45 = vld [vmem:[#allocation2 + $0x60] sm:$0xff] }
 0x12f   :  { %574 = vmatpush1.bf16.msra.mxu1 %v2353_v51  ;;  %605 = vmatprep.mubr.bf16.mxu1 %v2154_v2  ;;  %v985_v47 = vld [vmem:[#allocation2 + $0x80] sm:$0xff] }
 0x130   :  { %575 = vmatprep.subr.bf16.mxu1 %v2361_v16  ;;  %v1125_v49 = vld [vmem:[#allocation2 + $0xa0] sm:$0xff] }
 0x133   :  { %576 = vmatpush1.bf16.msra.mxu1 %v2368_v17 }
 0x134   :  { %577 = vmatprep.subr.bf16.mxu1 %v2375_v52 }
 0x137   :  { %578 = vmatpush1.bf16.msra.mxu1 %v2382_v53 }
 0x138   :  { %579 = vmatprep.subr.bf16.mxu1 %v2389_v54 }
 0x13b   :  { %580 = vmatpush1.bf16.msra.mxu1 %v2396_v55 }
 0x13c   :  { %713 = vmatprep.subr.bf16.mxu1 %v2346_v50 }
 0x1a4   :  { %v377_v38 = vpop.permute.xlu1 %376 }
 0x1a8   :  { %v380_v39 = vpop.permute.xlu1 %379 }
 0x1a9   :  { %v382_v41 = vsel %vm372_vm4, 0, %v380_v39 }
 0x1aa   :  { %vm679_vm5 = vcmp.le.s32.totalorder %v382_v41, 1  ;;  %vm819_vm7 = vcmp.le.s32.totalorder %v382_v41, 2  ;;  %vm959_vm10 = vcmp.le.s32.totalorder %v382_v41, 3  ;;  %vm1099_vm13 = vcmp.le.s32.totalorder %v382_v41, 4 }
 0x1ab   :  { %vm1239_vm15 = vcmp.le.s32.totalorder %v382_v41, 5  ;;  %vm1379_vm2 = vcmp.le.s32.totalorder %v382_v41, 6 }
 0x1ac   :  { %v390_v40 = vpop.permute.xlu1 %389 }
 0x1ad   :  { %v392_v42 = vsel %vm372_vm4, %v390_v40, 7 }
 0x1ae   :  { %vm681_vm6 = vcmp.ge.s32.totalorder %v392_v42, 1  ;;  %vm821_vm8 = vcmp.ge.s32.totalorder %v392_v42, 2  ;;  %vm961_vm11 = vcmp.ge.s32.totalorder %v392_v42, 3  ;;  %vm1101_vm14 = vcmp.ge.s32.totalorder %v392_v42, 4 }
 0x1af   :  { %vm2432_vm9 = vmand %vm679_vm5, %vm681_vm6  ;;  %vm1241_vm1 = vcmp.ge.s32.totalorder %v392_v42, 5  ;;  %vm1381_vm3 = vcmp.ge.s32.totalorder %v392_v42, 6  ;;  %vm1519_vm6 = vcmp.le.s32.totalorder %v382_v41, 7 }
 0x1b0   :  { %vm2436_vm12 = vmand %vm819_vm7, %vm821_vm8  ;;  %vm1521_vm7 = vcmp.ge.s32.totalorder %v392_v42, 7 }
 0x1b1   :  { %vm2440_vm0 = vmand %vm959_vm10, %vm961_vm11 }
 0x1b2   :  { %vm2444_vm5 = vmand %vm1099_vm13, %vm1101_vm14  ;;  %vm539_vm13 = vcmp.le.s32.totalorder %v382_v41, 0  ;;  %vm541_vm14 = vcmp.ge.s32.totalorder %v392_v42, 0 }
 0x1b3   :  { %vm2448_vm8 = vmand %vm1239_vm15, %vm1241_vm1 }
 0x1b4   :  { %vm2452_vm10 = vmand %vm1379_vm2, %vm1381_vm3 }
 0x1b5   :  { %vm2456_vm11 = vmand %vm1519_vm6, %vm1521_vm7  ;;  %vm437_vm6 = vcmask 523264  }
 0x1b6   :  { %vm543_vm2 = vmand %vm539_vm13, %vm541_vm14 }
 0x201   :  { %v475_v63 = vpop.f32.mrb[0].mxu1 }
 0x202   :  { %v484_v1 = vadd.f32 %v475_v63, %v393_v61  ;;  %v477_v3 = vpop.f32.mrb[1].mxu1 }
 0x203   :  { %v485_v5 = vadd.f32 %v477_v3, %v394_v62  ;;  %v479_v6 = vpop.f32.mrb[2].mxu1 }
 0x204   :  { %v1814_v7 = vmul.f32 -1.442695, %v484_v1  ;;  %v486_v8 = vadd.f32 %v479_v6, %v395_v0  ;;  %v481_v9 = vpop.f32.mrb[3].mxu1 }
 0x205   :  { %v1815_v10 = vmul.f32 -1.442695, %v485_v5  ;;  %v487_v11 = vadd.f32 %v481_v9, %v396_v4  ;;  %v2466_v4 = vsel %vm372_vm4, 0, %v377_v38 }
 0x206   :  { %1954 = vpow2.f32 %v1814_v7  ;;  %v1816_v13 = vmul.f32 -1.442695, %v486_v8  ;;  %vm538_vm15 = vcmp.le.s32.totalorder %v2466_v4, 0 }
 0x207   :  { %1956 = vpow2.f32 %v1815_v10  ;;  %v1817_v14 = vmul.f32 -1.442695, %v487_v11 }
 0x209   :  { %1958 = vpow2.f32 %v1817_v14 }
 0x20a   :  { %1960 = vpow2.f32 %v1816_v13 }
 0x210   :  { %v1955_v15 = vpop.eup %1954 }
 0x211   :  { %v1957_v18 = vpop.eup %1956  ;;  %v500_v23 = vadd.f32 1.0, %v1955_v15  ;;  %v565_v15 = vld [vmem:[#allocation2 + $0x20] sm:$0xff] }
 0x212   :  { %v501_v20 = vadd.f32 1.0, %v1957_v18  ;;  %v566_v18 = vld [vmem:[#allocation2 + $0x28] sm:$0xff] }
 0x213   :  { %v1959_v22 = vpop.eup %1958 }
 0x214   :  { %1962 = vrcp.f32 %v501_v20  ;;  %v503_v24 = vadd.f32 1.0, %v1959_v22  ;;  %v1961_v25 = vpop.eup %1960  ;;  %v567_v22 = vld [vmem:[#allocation2 + $0x30] sm:$0xff] }
 0x215   :  { %v502_v28 = vadd.f32 1.0, %v1961_v25  ;;  %v568_v25 = vld [vmem:[#allocation2 + $0x38] sm:$0xff] }
 0x216   :  { %1964 = vrcp.f32 %v503_v24 }
 0x217   :  { %1966 = vrcp.f32 %v500_v23 }
 0x218   :  { %1968 = vrcp.f32 %v502_v28 }
 0x21e   :  { %v1963_v29 = vpop.eup %1962 }
 0x21f   :  { %v513_v30 = vmul.f32 %v1963_v29, %v2274_v19 }
 0x220   :  { %v1965_v31 = vpop.eup %1964 }
 0x221   :  { %v517_v32 = vadd.f32 %v513_v30, %v2276_v21  ;;  %v515_v33 = vmul.f32 %v1965_v31, %v2274_v19  ;;  %v1967_v34 = vpop.eup %1966 }
 0x222   :  { %v1969_v36 = vpop.eup %1968  ;;  %v520_v44 = vmul.f32 0.0, %v1967_v34 }
 0x223   :  { %v522_v35 = vmul.f32 %v1967_v34, %v517_v32  ;;  %v519_v26 = vadd.f32 %v515_v33, %v2276_v21  ;;  %v521_v57 = vmul.f32 0.0, %v1969_v36 }
 0x225   :  { %526 = vrot.lane.b32.xlu0 %v522_v35, %s2157_s1  ;;  %v523_v37 = vmul.f32 %v1969_v36, %v519_v26 }
 0x229   :  { %528 = vrot.lane.b32.xlu0 %v523_v37, %s2157_s1 }
 0x22d   :  { %386 = vperm.xlu0 %1941, %v1804_v27  }
 0x297   :  { %v527_v46 = vpop.permute.xlu0 %526 }
 0x298   :  { %v532_v48 = vadd.f32 %v527_v46, %v520_v44 }
 0x29a   :  { %1970 = vtanh.f32 %v532_v48 }
 0x29b   :  { %v529_v59 = vpop.permute.xlu0 %528 }
 0x29c   :  { %v533_v61 = vadd.f32 %v529_v59, %v521_v57 }
 0x29e   :  { %1972 = vtanh.f32 %v533_v61 }
 0x2a4   :  { %v1971_v62 = vpop.eup %1970 }
 0x2a5   :  { %v536_v63 = vmul.f32 %v1971_v62, %v517_v32 }
 0x2a7   :  { %546 = vrot.lane.b32.xlu1 %v536_v63, %s2157_s1 }
 0x2a8   :  { %v1973_v0 = vpop.eup %1972 }
 0x2a9   :  { %v537_v1 = vmul.f32 %v1973_v0, %v519_v26 }
 0x2ab   :  { %556 = vrot.lane.b32.xlu1 %v532_v48, %s2157_s1  ;;  %548 = vrot.lane.b32.xlu0 %v537_v1, %s2157_s1 }
 0x2ac   :  { %v387_v3 = vpop.permute.xlu0 %386 }
 0x2ad   :  { %v2470_v5 = vsel %vm372_vm4, %v387_v3, 7  ;;  %vm678_vm4 = vcmp.le.s32.totalorder %v2466_v4, 1 }
 0x2ae   :  { %vm540_vm1 = vcmp.ge.s32.totalorder %v2470_v5, 0  ;;  %vm680_vm7 = vcmp.ge.s32.totalorder %v2470_v5, 1  ;;  %vm820_vm14 = vcmp.ge.s32.totalorder %v2470_v5, 2 }
 0x2af   :  { %558 = vrot.lane.b32.xlu0 %v533_v61, %s2157_s1  ;;  %vm542_vm3 = vmand %vm538_vm15, %vm540_vm1  ;;  %vm960_vm1 = vcmp.ge.s32.totalorder %v2470_v5, 3 }
 0x2b0   :  { %vm682_vm13 = vmand %vm678_vm4, %vm680_vm7  ;;  %vm1240_vm7 = vcmp.ge.s32.totalorder %v2470_v5, 5 }
 0x319   :  { %v547_v6 = vpop.permute.xlu1 %546 }
 0x31a   :  { %v2474_v9 = vsel %vm542_vm3, %v547_v6, 0.0 }
 0x31d   :  { %v557_v7 = vpop.permute.xlu1 %556  ;;  %v549_v8 = vpop.permute.xlu0 %548 }
 0x31e   :  { %v2476_v10 = vsel %vm542_vm3, %v557_v7, 0.0  ;;  %v2478_v11 = vsel %vm543_vm2, %v549_v8, 0.0  ;;  %vm1100_vm3 = vcmp.ge.s32.totalorder %v2470_v5, 4 }
 0x31f   :  { %v569_v12 = vpack.c.bf16 %v2478_v11, %v2474_v9  ;;  %654 = vrot.lane.b32.xlu1 %v2476_v10, %s2157_s1 }
 0x321   :  { %1818 = vmatmul.mubr.msk.bf16.vlgmr.msra.gmra.mrb[4].mxu1 %vm437_vm6, %v569_v12  ;;  %v559_v13 = vpop.permute.xlu0 %558 }
 0x322   :  { %v2485_v14 = vsel %vm543_vm2, %v559_v13, 0.0  ;;  %714 = vmatpush1.bf16.msra.mxu1 %v2353_v51  ;;  %745 = vmatprep.mubr.bf16.mxu1 %v2154_v2 }
 0x323   :  { %656 = vrot.lane.b32.xlu0 %v2485_v14, %s2157_s1  ;;  %715 = vmatprep.subr.bf16.mxu1 %v2361_v16 }
 0x326   :  { %716 = vmatpush1.bf16.msra.mxu1 %v2368_v17 }
 0x327   :  { %717 = vmatprep.subr.bf16.mxu1 %v2375_v52 }
 0x32a   :  { %718 = vmatpush1.bf16.msra.mxu1 %v2382_v53 }
 0x32b   :  { %719 = vmatprep.subr.bf16.mxu1 %v2389_v54 }
 0x32e   :  { %720 = vmatpush1.bf16.msra.mxu1 %v2396_v55 }
 0x32f   :  { %853 = vmatprep.subr.bf16.mxu1 %v2346_v50 }
 0x391   :  { %v655_v3 = vpop.permute.xlu1 %654 }
 0x395   :  { %v657_v6 = vpop.permute.xlu0 %656 }
 0x3f4   :  { %v607_v20 = vpop.f32.mrb[4].mxu1 }
 0x3f5   :  { %v616_v23 = vadd.f32 %v607_v20, %v565_v15  ;;  %v609_v24 = vpop.f32.mrb[5].mxu1 }
 0x3f6   :  { %v617_v28 = vadd.f32 %v609_v24, %v566_v18  ;;  %v611_v29 = vpop.f32.mrb[6].mxu1 }
 0x3f7   :  { %v1819_v30 = vmul.f32 -1.442695, %v616_v23  ;;  %v618_v31 = vadd.f32 %v611_v29, %v567_v22  ;;  %v613_v32 = vpop.f32.mrb[7].mxu1 }
 0x3f8   :  { %v1820_v33 = vmul.f32 -1.442695, %v617_v28  ;;  %v619_v34 = vadd.f32 %v613_v32, %v568_v25 }
 0x3f9   :  { %1974 = vpow2.f32 %v1819_v30  ;;  %v1821_v35 = vmul.f32 -1.442695, %v618_v31 }
 0x3fa   :  { %1976 = vpow2.f32 %v1820_v33  ;;  %v1822_v26 = vmul.f32 -1.442695, %v619_v34 }
 0x3fb   :  { %1978 = vpow2.f32 %v1821_v35 }
 0x3fc   :  { %1980 = vpow2.f32 %v1822_v26 }
 0x403   :  { %v1975_v36 = vpop.eup %1974 }
 0x404   :  { %v1977_v37 = vpop.eup %1976  ;;  %v632_v40 = vadd.f32 1.0, %v1975_v36  ;;  %v708_v36 = vld [vmem:[#allocation2 + $0x58] sm:$0xff] }
 0x405   :  { %v1979_v27 = vpop.eup %1978  ;;  %v633_v38 = vadd.f32 1.0, %v1977_v37 }
 0x406   :  { %v1981_v39 = vpop.eup %1980  ;;  %v634_v42 = vadd.f32 1.0, %v1979_v27 }
 0x407   :  { %1982 = vrcp.f32 %v633_v38  ;;  %v635_v41 = vadd.f32 1.0, %v1981_v39 }
 0x409   :  { %1984 = vrcp.f32 %v635_v41 }
 0x40a   :  { %1986 = vrcp.f32 %v632_v40 }
 0x40b   :  { %1988 = vrcp.f32 %v634_v42 }
 0x411   :  { %v1983_v44 = vpop.eup %1982 }
 0x412   :  { %v645_v46 = vmul.f32 %v1983_v44, %v2274_v19 }
 0x413   :  { %v1985_v48 = vpop.eup %1984 }
 0x414   :  { %v649_v57 = vadd.f32 %v645_v46, %v2276_v21  ;;  %v647_v59 = vmul.f32 %v1985_v48, %v2274_v19  ;;  %v1987_v61 = vpop.eup %1986 }
 0x415   :  { %v1989_v0 = vpop.eup %1988  ;;  %v660_v7 = vmul.f32 %v1987_v61, %v655_v3 }
 0x416   :  { %v662_v62 = vmul.f32 %v1987_v61, %v649_v57  ;;  %v651_v63 = vadd.f32 %v647_v59, %v2276_v21  ;;  %v661_v13 = vmul.f32 %v1989_v0, %v657_v6 }
 0x418   :  { %666 = vrot.lane.b32.xlu1 %v662_v62, %s2157_s1  ;;  %v663_v1 = vmul.f32 %v1989_v0, %v651_v63 }
 0x41a   :  { %668 = vrot.lane.b32.xlu0 %v663_v1, %s2157_s1 }
 0x48a   :  { %v667_v8 = vpop.permute.xlu1 %666 }
 0x48b   :  { %v672_v12 = vadd.f32 %v667_v8, %v660_v7 }
 0x48c   :  { %v669_v15 = vpop.permute.xlu0 %668 }
 0x48d   :  { %1990 = vtanh.f32 %v672_v12  ;;  %v673_v18 = vadd.f32 %v669_v15, %v661_v13 }
 0x48f   :  { %1992 = vtanh.f32 %v673_v18 }
 0x497   :  { %v1991_v20 = vpop.eup %1990 }
 0x498   :  { %v676_v22 = vmul.f32 %v1991_v20, %v649_v57 }
 0x499   :  { %v1993_v23 = vpop.eup %1992 }
 0x49a   :  { %686 = vrot.lane.b32.xlu1 %v676_v22, %s2157_s1  ;;  %v677_v24 = vmul.f32 %v1993_v23, %v651_v63 }
 0x49c   :  { %688 = vrot.lane.b32.xlu0 %v677_v24, %s2157_s1 }
 0x49e   :  { %696 = vrot.lane.b32.xlu1 %v672_v12, %s2157_s1 }
 0x4a0   :  { %698 = vrot.lane.b32.xlu0 %v673_v18, %s2157_s1 }
 0x50c   :  { %v687_v25 = vpop.permute.xlu1 %686 }
 0x50d   :  { %v2511_v29 = vsel %vm682_vm13, %v687_v25, %v2474_v9 }
 0x50e   :  { %v689_v28 = vpop.permute.xlu0 %688 }
 0x50f   :  { %v2516_v30 = vsel %vm2432_vm9, %v689_v28, %v2478_v11 }
 0x510   :  { %v709_v31 = vpack.c.bf16 %v2516_v30, %v2511_v29  ;;  %v697_v32 = vpop.permute.xlu1 %696 }
 0x511   :  { %v2521_v33 = vsel %vm682_vm13, %v697_v32, %v2476_v10  ;;  %v706_v10 = vld [vmem:[#allocation2 + $0x48] sm:$0xff] }
 0x512   :  { %794 = vrot.lane.b32.xlu1 %v2521_v33, %s2157_s1  ;;  %1823 = vmatmul.mubr.msk.bf16.vlgmr.msra.gmra.mrb[8].mxu1 %vm437_vm6, %v709_v31  ;;  %v699_v34 = vpop.permute.xlu0 %698 }
 0x513   :  { %v2529_v9 = vsel %vm2432_vm9, %v699_v34, %v2485_v14  ;;  %854 = vmatpush1.bf16.msra.mxu1 %v2353_v51  ;;  %885 = vmatprep.mubr.bf16.mxu1 %v2154_v2  ;;  %v707_v14 = vld [vmem:[#allocation2 + $0x50] sm:$0xff]  ;;  %vm818_vm9 = vcmp.le.s32.totalorder %v2466_v4, 2 }
 0x514   :  { %796 = vrot.lane.b32.xlu0 %v2529_v9, %s2157_s1  ;;  %855 = vmatprep.subr.bf16.mxu1 %v2361_v16  ;;  %vm822_vm15 = vmand %vm818_vm9, %vm820_vm14  ;;  %vm1380_vm9 = vcmp.ge.s32.totalorder %v2470_v5, 6 }
 0x517   :  { %856 = vmatpush1.bf16.msra.mxu1 %v2368_v17 }
 0x518   :  { %857 = vmatprep.subr.bf16.mxu1 %v2375_v52 }
 0x51b   :  { %858 = vmatpush1.bf16.msra.mxu1 %v2382_v53 }
 0x51c   :  { %859 = vmatprep.subr.bf16.mxu1 %v2389_v54 }
 0x51f   :  { %860 = vmatpush1.bf16.msra.mxu1 %v2396_v55 }
 0x520   :  { %1133 = vmatprep.subr.bf16.mxu1 %v2346_v50 }
 0x584   :  { %v795_v23 = vpop.permute.xlu1 %794 }
 0x586   :  { %v797_v24 = vpop.permute.xlu0 %796 }
 0x5e5   :  { %v747_v11 = vpop.f32.mrb[8].mxu1 }
 0x5e6   :  { %v756_v35 = vadd.f32 %v747_v11, %v705_v43  ;;  %v749_v26 = vpop.f32.mrb[9].mxu1 }
 0x5e7   :  { %v757_v37 = vadd.f32 %v749_v26, %v706_v10  ;;  %v751_v27 = vpop.f32.mrb[10].mxu1 }
 0x5e8   :  { %v1824_v38 = vmul.f32 -1.442695, %v756_v35  ;;  %v758_v39 = vadd.f32 %v751_v27, %v707_v14  ;;  %v753_v40 = vpop.f32.mrb[11].mxu1 }
 0x5e9   :  { %v1825_v41 = vmul.f32 -1.442695, %v757_v37  ;;  %v759_v42 = vadd.f32 %v753_v40, %v708_v36 }
 0x5ea   :  { %1994 = vpow2.f32 %v1824_v38  ;;  %v1826_v44 = vmul.f32 -1.442695, %v758_v39 }
 0x5eb   :  { %1996 = vpow2.f32 %v1825_v41  ;;  %v1827_v46 = vmul.f32 -1.442695, %v759_v42 }
 0x5ec   :  { %1998 = vpow2.f32 %v1826_v44 }
 0x5ed   :  { %2000 = vpow2.f32 %v1827_v46  ;;  %v848_v46 = vld [vmem:[#allocation2 + $0x78] sm:$0xff] }
 0x5f4   :  { %v1995_v48 = vpop.eup %1994 }
 0x5f5   :  { %v1997_v57 = vpop.eup %1996  ;;  %v772_v63 = vadd.f32 1.0, %v1995_v48 }
 0x5f6   :  { %v1999_v59 = vpop.eup %1998  ;;  %v773_v61 = vadd.f32 1.0, %v1997_v57 }
 0x5f7   :  { %v2001_v62 = vpop.eup %2000  ;;  %v774_v1 = vadd.f32 1.0, %v1999_v59 }
 0x5f8   :  { %2002 = vrcp.f32 %v773_v61  ;;  %v775_v0 = vadd.f32 1.0, %v2001_v62 }
 0x5fa   :  { %2004 = vrcp.f32 %v775_v0 }
 0x5fb   :  { %2006 = vrcp.f32 %v772_v63 }
 0x5fc   :  { %2008 = vrcp.f32 %v774_v1 }
 0x602   :  { %v2003_v3 = vpop.eup %2002 }
 0x603   :  { %v785_v6 = vmul.f32 %v2003_v3, %v2274_v19 }
 0x604   :  { %v2005_v7 = vpop.eup %2004 }
 0x605   :  { %v789_v8 = vadd.f32 %v785_v6, %v2276_v21  ;;  %v787_v12 = vmul.f32 %v2005_v7, %v2274_v19  ;;  %v2007_v13 = vpop.eup %2006 }
 0x606   :  { %v2009_v20 = vpop.eup %2008  ;;  %v800_v25 = vmul.f32 %v2007_v13, %v795_v23 }
 0x607   :  { %v802_v15 = vmul.f32 %v2007_v13, %v789_v8  ;;  %v791_v18 = vadd.f32 %v787_v12, %v2276_v21  ;;  %v801_v32 = vmul.f32 %v2009_v20, %v797_v24 }
 0x609   :  { %806 = vrot.lane.b32.xlu1 %v802_v15, %s2157_s1  ;;  %v803_v22 = vmul.f32 %v2009_v20, %v791_v18 }
 0x60b   :  { %808 = vrot.lane.b32.xlu0 %v803_v22, %s2157_s1 }
 0x67b   :  { %v807_v28 = vpop.permute.xlu1 %806 }
 0x67c   :  { %v812_v31 = vadd.f32 %v807_v28, %v800_v25 }
 0x67d   :  { %v809_v34 = vpop.permute.xlu0 %808 }
 0x67e   :  { %2010 = vtanh.f32 %v812_v31  ;;  %v813_v43 = vadd.f32 %v809_v34, %v801_v32 }
 0x680   :  { %2012 = vtanh.f32 %v813_v43 }
 0x688   :  { %v2011_v10 = vpop.eup %2010 }
 0x689   :  { %v816_v11 = vmul.f32 %v2011_v10, %v789_v8 }
 0x68a   :  { %v2013_v14 = vpop.eup %2012 }
 0x68b   :  { %826 = vrot.lane.b32.xlu1 %v816_v11, %s2157_s1  ;;  %v817_v35 = vmul.f32 %v2013_v14, %v791_v18 }
 0x68d   :  { %828 = vrot.lane.b32.xlu0 %v817_v35, %s2157_s1 }
 0x68f   :  { %836 = vrot.lane.b32.xlu1 %v812_v31, %s2157_s1 }
 0x691   :  { %838 = vrot.lane.b32.xlu0 %v813_v43, %s2157_s1 }
 0x6fd   :  { %v827_v26 = vpop.permute.xlu1 %826 }
 0x6fe   :  { %v2555_v37 = vsel %vm822_vm15, %v827_v26, %v2511_v29 }
 0x6ff   :  { %v829_v36 = vpop.permute.xlu0 %828 }
 0x700   :  { %v2560_v27 = vsel %vm2436_vm12, %v829_v36, %v2516_v30  ;;  %v846_v30 = vld [vmem:[#allocation2 + $0x68] sm:$0xff] }
 0x701   :  { %v849_v38 = vpack.c.bf16 %v2560_v27, %v2555_v37  ;;  %v837_v39 = vpop.permute.xlu1 %836 }
 0x702   :  { %v2565_v40 = vsel %vm822_vm15, %v837_v39, %v2521_v33  ;;  %vm1520_vm15 = vcmp.ge.s32.totalorder %v2470_v5, 7  ;;  %v1853_v5 = vld [vmem:[%s2817_s6] ss:$0 sm:$0xff]  ;;  %s2158_s6 = smov [#allocation3]  }
 0x703   :  { %934 = vrot.lane.b32.xlu1 %v2565_v40, %s2157_s1  ;;  %1828 = vmatmul.mubr.msk.bf16.vlgmr.msra.gmra.mrb[12].mxu1 %vm437_vm6, %v849_v38  ;;  %v839_v41 = vpop.permute.xlu0 %838 }
 0x704   :  { %v2573_v29 = vsel %vm2436_vm12, %v839_v41, %v2529_v9  ;;  %1134 = vmatpush1.bf16.msra.mxu1 %v2353_v51  ;;  %1165 = vmatprep.mubr.bf16.mxu1 %v2154_v2  ;;  %v847_v9 = vld [vmem:[#allocation2 + $0x70] sm:$0xff]  ;;  %vm958_vm12 = vcmp.le.s32.totalorder %v2466_v4, 3 }
 0x705   :  { %936 = vrot.lane.b32.xlu0 %v2573_v29, %s2157_s1  ;;  %1135 = vmatprep.subr.bf16.mxu1 %v2361_v16  ;;  %vm962_vm2 = vmand %vm958_vm12, %vm960_vm1  ;;  %vm1642_vm1 = vcmask 64512  }
 0x708   :  { %1136 = vmatpush1.bf16.msra.mxu1 %v2368_v17 }
 0x709   :  { %1137 = vmatprep.subr.bf16.mxu1 %v2375_v52 }
 0x70c   :  { %1138 = vmatpush1.bf16.msra.mxu1 %v2382_v53 }
 0x70d   :  { %1139 = vmatprep.subr.bf16.mxu1 %v2389_v54 }
 0x710   :  { %1140 = vmatpush1.bf16.msra.mxu1 %v2396_v55 }
 0x711   :  { %1413 = vmatprep.subr.bf16.mxu1 %v2346_v50 }
 0x775   :  { %v935_v10 = vpop.permute.xlu1 %934 }
 0x777   :  { %v937_v11 = vpop.permute.xlu0 %936 }
 0x7d6   :  { %v887_v33 = vpop.f32.mrb[12].mxu1 }
 0x7d7   :  { %v896_v42 = vadd.f32 %v887_v33, %v845_v45  ;;  %v889_v44 = vpop.f32.mrb[13].mxu1 }
 0x7d8   :  { %v897_v48 = vadd.f32 %v889_v44, %v846_v30  ;;  %v891_v57 = vpop.f32.mrb[14].mxu1 }
 0x7d9   :  { %v1829_v59 = vmul.f32 -1.442695, %v896_v42  ;;  %v898_v61 = vadd.f32 %v891_v57, %v847_v9  ;;  %v893_v62 = vpop.f32.mrb[15].mxu1 }
 0x7da   :  { %v1830_v63 = vmul.f32 -1.442695, %v897_v48  ;;  %v899_v0 = vadd.f32 %v893_v62, %v848_v46 }
 0x7db   :  { %2014 = vpow2.f32 %v1829_v59  ;;  %v1831_v1 = vmul.f32 -1.442695, %v898_v61 }
 0x7dc   :  { %2016 = vpow2.f32 %v1830_v63  ;;  %v1832_v3 = vmul.f32 -1.442695, %v899_v0  ;;  %v988_v0 = vld [vmem:[#allocation2 + $0x98] sm:$0xff] }
 0x7dd   :  { %2018 = vpow2.f32 %v1831_v1 }
 0x7de   :  { %2020 = vpow2.f32 %v1832_v3 }
 0x7e5   :  { %v2015_v50 = vpop.eup %2014 }
 0x7e6   :  { %v2017_v6 = vpop.eup %2016  ;;  %v912_v13 = vadd.f32 1.0, %v2015_v50 }
 0x7e7   :  { %v2019_v7 = vpop.eup %2018  ;;  %v913_v8 = vadd.f32 1.0, %v2017_v6 }
 0x7e8   :  { %v2021_v12 = vpop.eup %2020  ;;  %v914_v18 = vadd.f32 1.0, %v2019_v7 }
 0x7e9   :  { %2022 = vrcp.f32 %v913_v8  ;;  %v915_v15 = vadd.f32 1.0, %v2021_v12 }
 0x7eb   :  { %2024 = vrcp.f32 %v915_v15 }
 0x7ec   :  { %2026 = vrcp.f32 %v912_v13 }
 0x7ed   :  { %2028 = vrcp.f32 %v914_v18 }
 0x7f3   :  { %v2023_v20 = vpop.eup %2022 }
 0x7f4   :  { %v925_v22 = vmul.f32 %v2023_v20, %v2274_v19 }
 0x7f5   :  { %v2025_v23 = vpop.eup %2024 }
 0x7f6   :  { %v929_v24 = vadd.f32 %v925_v22, %v2276_v21  ;;  %v927_v25 = vmul.f32 %v2025_v23, %v2274_v19  ;;  %v2027_v28 = vpop.eup %2026 }
 0x7f7   :  { %v2029_v34 = vpop.eup %2028  ;;  %v940_v14 = vmul.f32 %v2027_v28, %v935_v10 }
 0x7f8   :  { %v942_v31 = vmul.f32 %v2027_v28, %v929_v24  ;;  %v931_v32 = vadd.f32 %v927_v25, %v2276_v21  ;;  %v941_v36 = vmul.f32 %v2029_v34, %v937_v11 }
 0x7fa   :  { %946 = vrot.lane.b32.xlu1 %v942_v31, %s2157_s1  ;;  %v943_v43 = vmul.f32 %v2029_v34, %v931_v32 }
 0x7fc   :  { %948 = vrot.lane.b32.xlu0 %v943_v43, %s2157_s1 }
 0x86c   :  { %v947_v35 = vpop.permute.xlu1 %946 }
 0x86d   :  { %v952_v26 = vadd.f32 %v947_v35, %v940_v14 }
 0x86e   :  { %v949_v38 = vpop.permute.xlu0 %948 }
 0x86f   :  { %2030 = vtanh.f32 %v952_v26  ;;  %v953_v39 = vadd.f32 %v949_v38, %v941_v36 }
 0x871   :  { %2032 = vtanh.f32 %v953_v39 }
 0x879   :  { %v2031_v41 = vpop.eup %2030 }
 0x87a   :  { %v956_v45 = vmul.f32 %v2031_v41, %v929_v24 }
 0x87b   :  { %v2033_v30 = vpop.eup %2032 }
 0x87c   :  { %966 = vrot.lane.b32.xlu1 %v956_v45, %s2157_s1  ;;  %v957_v33 = vmul.f32 %v2033_v30, %v931_v32 }
 0x87e   :  { %968 = vrot.lane.b32.xlu0 %v957_v33, %s2157_s1 }
 0x880   :  { %976 = vrot.lane.b32.xlu1 %v952_v26, %s2157_s1 }
 0x882   :  { %978 = vrot.lane.b32.xlu0 %v953_v39, %s2157_s1 }
 0x8ee   :  { %v967_v9 = vpop.permute.xlu1 %966 }
 0x8ef   :  { %v2599_v44 = vsel %vm962_vm2, %v967_v9, %v2555_v37 }
 0x8f0   :  { %v969_v42 = vpop.permute.xlu0 %968 }
 0x8f1   :  { %v2604_v46 = vsel %vm2440_vm0, %v969_v42, %v2560_v27  ;;  %v986_v27 = vld [vmem:[#allocation2 + $0x88] sm:$0xff] }
 0x8f2   :  { %v989_v48 = vpack.c.bf16 %v2604_v46, %v2599_v44  ;;  %v977_v57 = vpop.permute.xlu1 %976 }
 0x8f3   :  { %v2609_v59 = vsel %vm962_vm2, %v977_v57, %v2565_v40 }
 0x8f4   :  { %1074 = vrot.lane.b32.xlu1 %v2609_v59, %s2157_s1  ;;  %1833 = vmatmul.mubr.msk.bf16.vlgmr.msra.gmra.mrb[32].mxu0 %vm437_vm6, %v989_v48  ;;  %v979_v61 = vpop.permute.xlu0 %978 }
 0x8f5   :  { %v2617_v37 = vsel %vm2440_vm0, %v979_v61, %v2573_v29  ;;  %1274 = vmatpush1.bf16.msra.mxu0 %v2353_v51  ;;  %1305 = vmatprep.mubr.bf16.mxu0 %v2154_v2  ;;  %v987_v29 = vld [vmem:[#allocation2 + $0x90] sm:$0xff]  ;;  %vm1098_vm0 = vcmp.le.s32.totalorder %v2466_v4, 4 }
 0x8f6   :  { %1076 = vrot.lane.b32.xlu0 %v2617_v37, %s2157_s1  ;;  %1275 = vmatprep.subr.bf16.mxu0 %v2361_v16  ;;  %vm1102_vm4 = vmand %vm1098_vm0, %vm1100_vm3 }
 0x8f9   :  { %1276 = vmatpush1.bf16.msra.mxu0 %v2368_v17 }
 0x8fa   :  { %1277 = vmatprep.subr.bf16.mxu0 %v2375_v52 }
 0x8fd   :  { %1278 = vmatpush1.bf16.msra.mxu0 %v2382_v53 }
 0x8fe   :  { %1279 = vmatprep.subr.bf16.mxu0 %v2389_v54 }
 0x901   :  { %1280 = vmatpush1.bf16.msra.mxu0 %v2396_v55 }
 0x966   :  { %v1075_v39 = vpop.permute.xlu1 %1074 }
 0x968   :  { %v1077_v41 = vpop.permute.xlu0 %1076 }
 0x9c7   :  { %v1027_v40 = vpop.f32.mrb[32].mxu0 }
 0x9c8   :  { %v1036_v62 = vadd.f32 %v1027_v40, %v985_v47  ;;  %v1029_v63 = vpop.f32.mrb[33].mxu0 }
 0x9c9   :  { %v1037_v1 = vadd.f32 %v1029_v63, %v986_v27  ;;  %v1031_v3 = vpop.f32.mrb[34].mxu0 }
 0x9ca   :  { %v1834_v50 = vmul.f32 -1.442695, %v1036_v62  ;;  %v1038_v6 = vadd.f32 %v1031_v3, %v987_v29  ;;  %v1033_v7 = vpop.f32.mrb[35].mxu0 }
 0x9cb   :  { %v1835_v8 = vmul.f32 -1.442695, %v1037_v1  ;;  %v1039_v12 = vadd.f32 %v1033_v7, %v988_v0 }
 0x9cc   :  { %2034 = vpow2.f32 %v1834_v50  ;;  %v1836_v13 = vmul.f32 -1.442695, %v1038_v6  ;;  %v1128_v6 = vld [vmem:[#allocation2 + $0xb8] sm:$0xff] }
 0x9cd   :  { %2036 = vpow2.f32 %v1835_v8  ;;  %v1837_v15 = vmul.f32 -1.442695, %v1039_v12 }
 0x9ce   :  { %2038 = vpow2.f32 %v1836_v13 }
 0x9cf   :  { %2040 = vpow2.f32 %v1837_v15 }
 0x9d6   :  { %v2035_v18 = vpop.eup %2034 }
 0x9d7   :  { %v2037_v20 = vpop.eup %2036  ;;  %v1052_v25 = vadd.f32 1.0, %v2035_v18 }
 0x9d8   :  { %v2039_v22 = vpop.eup %2038  ;;  %v1053_v23 = vadd.f32 1.0, %v2037_v20 }
 0x9d9   :  { %v2041_v24 = vpop.eup %2040  ;;  %v1054_v31 = vadd.f32 1.0, %v2039_v22 }
 0x9da   :  { %2042 = vrcp.f32 %v1053_v23  ;;  %v1055_v28 = vadd.f32 1.0, %v2041_v24 }
 0x9dc   :  { %2044 = vrcp.f32 %v1055_v28 }
 0x9dd   :  { %2046 = vrcp.f32 %v1052_v25 }
 0x9de   :  { %2048 = vrcp.f32 %v1054_v31 }
 0x9e4   :  { %v2043_v32 = vpop.eup %2042 }
 0x9e5   :  { %v1065_v34 = vmul.f32 %v2043_v32, %v2274_v19 }
 0x9e6   :  { %v2045_v43 = vpop.eup %2044 }
 0x9e7   :  { %v1069_v10 = vadd.f32 %v1065_v34, %v2276_v21  ;;  %v1067_v11 = vmul.f32 %v2045_v43, %v2274_v19  ;;  %v2047_v14 = vpop.eup %2046 }
 0x9e8   :  { %v2049_v36 = vpop.eup %2048  ;;  %v1080_v45 = vmul.f32 %v2047_v14, %v1075_v39 }
 0x9e9   :  { %v1082_v35 = vmul.f32 %v2047_v14, %v1069_v10  ;;  %v1071_v26 = vadd.f32 %v1067_v11, %v2276_v21  ;;  %v1081_v9 = vmul.f32 %v2049_v36, %v1077_v41 }
 0x9eb   :  { %1086 = vrot.lane.b32.xlu1 %v1082_v35, %s2157_s1  ;;  %v1083_v38 = vmul.f32 %v2049_v36, %v1071_v26 }
 0x9ed   :  { %1088 = vrot.lane.b32.xlu0 %v1083_v38, %s2157_s1 }
 0xa5d   :  { %v1087_v30 = vpop.permute.xlu1 %1086 }
 0xa5e   :  { %v1092_v33 = vadd.f32 %v1087_v30, %v1080_v45 }
 0xa5f   :  { %v1089_v42 = vpop.permute.xlu0 %1088 }
 0xa60   :  { %2050 = vtanh.f32 %v1092_v33  ;;  %v1093_v48 = vadd.f32 %v1089_v42, %v1081_v9 }
 0xa62   :  { %2052 = vtanh.f32 %v1093_v48 }
 0xa6a   :  { %v2051_v57 = vpop.eup %2050 }
 0xa6b   :  { %v1096_v61 = vmul.f32 %v2051_v57, %v1069_v10 }
 0xa6c   :  { %v2053_v47 = vpop.eup %2052 }
 0xa6d   :  { %1106 = vrot.lane.b32.xlu1 %v1096_v61, %s2157_s1  ;;  %v1097_v27 = vmul.f32 %v2053_v47, %v1071_v26 }
 0xa6f   :  { %1108 = vrot.lane.b32.xlu0 %v1097_v27, %s2157_s1 }
 0xa71   :  { %1116 = vrot.lane.b32.xlu1 %v1092_v33, %s2157_s1 }
 0xa73   :  { %1118 = vrot.lane.b32.xlu0 %v1093_v48, %s2157_s1 }
 0xadf   :  { %v1107_v40 = vpop.permute.xlu1 %1106 }
 0xae0   :  { %v2642_v62 = vsel %vm1102_vm4, %v1107_v40, %v2599_v44 }
 0xae1   :  { %v1109_v29 = vpop.permute.xlu0 %1108 }
 0xae2   :  { %v2647_v63 = vsel %vm2444_vm5, %v1109_v29, %v2604_v46  ;;  %v1126_v46 = vld [vmem:[#allocation2 + $0xa8] sm:$0xff] }
 0xae3   :  { %v1129_v0 = vpack.c.bf16 %v2647_v63, %v2642_v62  ;;  %v1117_v1 = vpop.permute.xlu1 %1116 }
 0xae4   :  { %v2652_v3 = vsel %vm1102_vm4, %v1117_v1, %v2609_v59  ;;  %v1127_v59 = vld [vmem:[#allocation2 + $0xb0] sm:$0xff] }
 0xae5   :  { %1214 = vrot.lane.b32.xlu1 %v2652_v3, %s2157_s1  ;;  %1838 = vmatmul.mubr.msk.bf16.vlgmr.msra.gmra.mrb[16].mxu1 %vm437_vm6, %v1129_v0  ;;  %v1119_v50 = vpop.permute.xlu0 %1118 }
 0xae6   :  { %v2660_v44 = vsel %vm2444_vm5, %v1119_v50, %v2617_v37  ;;  %1414 = vmatpush1.bf16.msra.mxu1 %v2353_v51  ;;  %1445 = vmatprep.mubr.bf16.mxu1 %v2154_v2  ;;  %vm1238_vm5 = vcmp.le.s32.totalorder %v2466_v4, 5 }
 0xae7   :  { %1216 = vrot.lane.b32.xlu0 %v2660_v44, %s2157_s1  ;;  %1415 = vmatprep.subr.bf16.mxu1 %v2361_v16  ;;  %vm1242_vm13 = vmand %vm1238_vm5, %vm1240_vm7 }
 0xaea   :  { %1416 = vmatpush1.bf16.msra.mxu1 %v2368_v17 }
 0xaeb   :  { %1417 = vmatprep.subr.bf16.mxu1 %v2375_v52 }
 0xaee   :  { %1418 = vmatpush1.bf16.msra.mxu1 %v2382_v53 }
 0xaef   :  { %1419 = vmatprep.subr.bf16.mxu1 %v2389_v54 }
 0xaf2   :  { %1420 = vmatpush1.bf16.msra.mxu1 %v2396_v55 }
 0xb57   :  { %v1215_v36 = vpop.permute.xlu1 %1214 }
 0xb59   :  { %v1217_v38 = vpop.permute.xlu0 %1216 }
 0xbb8   :  { %v1167_v51 = vpop.f32.mrb[16].mxu1 }
 0xbb9   :  { %v1176_v2 = vadd.f32 %v1167_v51, %v1125_v49  ;;  %v1169_v37 = vpop.f32.mrb[17].mxu1 }
 0xbba   :  { %v1177_v7 = vadd.f32 %v1169_v37, %v1126_v46  ;;  %v1171_v8 = vpop.f32.mrb[18].mxu1  ;;  %v1266_v46 = vld [vmem:[#allocation2 + $0xc8] sm:$0xff]  ;;  %v1268_v37 = vld [vmem:[#allocation2 + $0xd8] sm:$0xff] }
 0xbbb   :  { %v1839_v16 = vmul.f32 -1.442695, %v1176_v2  ;;  %v1178_v12 = vadd.f32 %v1171_v8, %v1127_v59  ;;  %v1173_v17 = vpop.f32.mrb[19].mxu1  ;;  %v1267_v59 = vld [vmem:[#allocation2 + $0xd0] sm:$0xff] }
 0xbbc   :  { %v1840_v13 = vmul.f32 -1.442695, %v1177_v7  ;;  %v1179_v52 = vadd.f32 %v1173_v17, %v1128_v6 }
 0xbbd   :  { %2054 = vpow2.f32 %v1839_v16  ;;  %v1841_v53 = vmul.f32 -1.442695, %v1178_v12 }
 0xbbe   :  { %2056 = vpow2.f32 %v1840_v13  ;;  %v1842_v54 = vmul.f32 -1.442695, %v1179_v52 }
 0xbbf   :  { %2058 = vpow2.f32 %v1841_v53 }
 0xbc0   :  { %2060 = vpow2.f32 %v1842_v54 }
 0xbc7   :  { %v2055_v55 = vpop.eup %2054 }
 0xbc8   :  { %v2057_v15 = vpop.eup %2056  ;;  %v1192_v23 = vadd.f32 1.0, %v2055_v55 }
 0xbc9   :  { %v2059_v18 = vpop.eup %2058  ;;  %v1193_v20 = vadd.f32 1.0, %v2057_v15 }
 0xbca   :  { %v2061_v22 = vpop.eup %2060  ;;  %v1194_v25 = vadd.f32 1.0, %v2059_v18 }
 0xbcb   :  { %2062 = vrcp.f32 %v1193_v20  ;;  %v1195_v24 = vadd.f32 1.0, %v2061_v22 }
 0xbcd   :  { %2064 = vrcp.f32 %v1195_v24 }
 0xbce   :  { %2066 = vrcp.f32 %v1192_v23 }
 0xbcf   :  { %2068 = vrcp.f32 %v1194_v25 }
 0xbd5   :  { %v2063_v28 = vpop.eup %2062 }
 0xbd6   :  { %v1205_v31 = vmul.f32 %v2063_v28, %v2274_v19 }
 0xbd7   :  { %v2065_v32 = vpop.eup %2064 }
 0xbd8   :  { %v1209_v34 = vadd.f32 %v1205_v31, %v2276_v21  ;;  %v1207_v43 = vmul.f32 %v2065_v32, %v2274_v19  ;;  %v2067_v10 = vpop.eup %2066 }
 0xbd9   :  { %v2069_v35 = vpop.eup %2068  ;;  %v1220_v39 = vmul.f32 %v2067_v10, %v1215_v36 }
 0xbda   :  { %v1222_v11 = vmul.f32 %v2067_v10, %v1209_v34  ;;  %v1211_v14 = vadd.f32 %v1207_v43, %v2276_v21  ;;  %v1221_v30 = vmul.f32 %v2069_v35, %v1217_v38 }
 0xbdc   :  { %1226 = vrot.lane.b32.xlu1 %v1222_v11, %s2157_s1  ;;  %v1223_v26 = vmul.f32 %v2069_v35, %v1211_v14 }
 0xbde   :  { %1228 = vrot.lane.b32.xlu0 %v1223_v26, %s2157_s1 }
 0xc4e   :  { %v1227_v41 = vpop.permute.xlu1 %1226 }
 0xc4f   :  { %v1232_v45 = vadd.f32 %v1227_v41, %v1220_v39 }
 0xc50   :  { %v1229_v33 = vpop.permute.xlu0 %1228 }
 0xc51   :  { %2070 = vtanh.f32 %v1232_v45  ;;  %v1233_v9 = vadd.f32 %v1229_v33, %v1221_v30 }
 0xc53   :  { %2072 = vtanh.f32 %v1233_v9 }
 0xc5b   :  { %v2071_v42 = vpop.eup %2070 }
 0xc5c   :  { %v1236_v48 = vmul.f32 %v2071_v42, %v1209_v34 }
 0xc5d   :  { %v2073_v57 = vpop.eup %2072 }
 0xc5e   :  { %1246 = vrot.lane.b32.xlu1 %v1236_v48, %s2157_s1  ;;  %v1237_v61 = vmul.f32 %v2073_v57, %v1211_v14 }
 0xc60   :  { %1248 = vrot.lane.b32.xlu0 %v1237_v61, %s2157_s1 }
 0xc62   :  { %1256 = vrot.lane.b32.xlu1 %v1232_v45, %s2157_s1 }
 0xc64   :  { %1258 = vrot.lane.b32.xlu0 %v1233_v9, %s2157_s1 }
 0xcd0   :  { %v1247_v47 = vpop.permute.xlu1 %1246 }
 0xcd1   :  { %v2685_v40 = vsel %vm1242_vm13, %v1247_v47, %v2642_v62 }
 0xcd2   :  { %v1249_v27 = vpop.permute.xlu0 %1248 }
 0xcd3   :  { %v2690_v29 = vsel %vm2448_vm8, %v1249_v27, %v2647_v63  ;;  %v1265_v63 = vld [vmem:[#allocation2 + $0xc0] sm:$0xff] }
 0xcd4   :  { %v1269_v0 = vpack.c.bf16 %v2690_v29, %v2685_v40  ;;  %v1257_v1 = vpop.permute.xlu1 %1256 }
 0xcd5   :  { %v2695_v50 = vsel %vm1242_vm13, %v1257_v1, %v2652_v3 }
 0xcd6   :  { %1354 = vrot.lane.b32.xlu1 %v2695_v50, %s2157_s1  ;;  %1843 = vmatmul.mubr.msk.bf16.vlgmr.msra.gmra.mrb[36].mxu0 %vm437_vm6, %v1269_v0  ;;  %v1259_v49 = vpop.permute.xlu0 %1258 }
 0xcd7   :  { %v2703_v62 = vsel %vm2448_vm8, %v1259_v49, %v2660_v44  ;;  %vm1378_vm8 = vcmp.le.s32.totalorder %v2466_v4, 6 }
 0xcd8   :  { %1356 = vrot.lane.b32.xlu0 %v2703_v62, %s2157_s1  ;;  %vm1382_vm14 = vmand %vm1378_vm8, %vm1380_vm9 }
 0xd48   :  { %v1355_v14 = vpop.permute.xlu1 %1354 }
 0xd4a   :  { %v1357_v35 = vpop.permute.xlu0 %1356 }
 0xda9   :  { %v1307_v51 = vpop.f32.mrb[36].mxu0 }
 0xdaa   :  { %v1316_v3 = vadd.f32 %v1307_v51, %v1265_v63  ;;  %v1309_v2 = vpop.f32.mrb[37].mxu0  ;;  %v1405_v63 = vld [vmem:[#allocation2 + $0xe0] sm:$0xff]  ;;  %v1407_v51 = vld [vmem:[#allocation2 + $0xf0] sm:$0xff] }
 0xdab   :  { %v1317_v6 = vadd.f32 %v1309_v2, %v1266_v46  ;;  %v1311_v7 = vpop.f32.mrb[38].mxu0  ;;  %v1408_v2 = vld [vmem:[#allocation2 + $0xf8] sm:$0xff] }
 0xdac   :  { %v1844_v8 = vmul.f32 -1.442695, %v1316_v3  ;;  %v1318_v16 = vadd.f32 %v1311_v7, %v1267_v59  ;;  %v1313_v12 = vpop.f32.mrb[39].mxu0 }
 0xdad   :  { %v1845_v17 = vmul.f32 -1.442695, %v1317_v6  ;;  %v1319_v13 = vadd.f32 %v1313_v12, %v1268_v37 }
 0xdae   :  { %2074 = vpow2.f32 %v1844_v8  ;;  %v1846_v56 = vmul.f32 -1.442695, %v1318_v16 }
 0xdaf   :  { %2076 = vpow2.f32 %v1845_v17  ;;  %v1847_v44 = vmul.f32 -1.442695, %v1319_v13 }
 0xdb0   :  { %2078 = vpow2.f32 %v1846_v56 }
 0xdb1   :  { %2080 = vpow2.f32 %v1847_v44 }
 0xdb8   :  { %v2075_v52 = vpop.eup %2074 }
 0xdb9   :  { %v2077_v53 = vpop.eup %2076  ;;  %v1332_v18 = vadd.f32 1.0, %v2075_v52 }
 0xdba   :  { %v2079_v54 = vpop.eup %2078  ;;  %v1333_v55 = vadd.f32 1.0, %v2077_v53 }
 0xdbb   :  { %v2081_v15 = vpop.eup %2080  ;;  %v1334_v22 = vadd.f32 1.0, %v2079_v54 }
 0xdbc   :  { %2082 = vrcp.f32 %v1333_v55  ;;  %v1335_v20 = vadd.f32 1.0, %v2081_v15 }
 0xdbe   :  { %2084 = vrcp.f32 %v1335_v20 }
 0xdbf   :  { %2086 = vrcp.f32 %v1332_v18 }
 0xdc0   :  { %2088 = vrcp.f32 %v1334_v22 }
 0xdc6   :  { %v2083_v23 = vpop.eup %2082 }
 0xdc7   :  { %v1345_v24 = vmul.f32 %v2083_v23, %v2274_v19 }
 0xdc8   :  { %v2085_v25 = vpop.eup %2084 }
 0xdc9   :  { %v1349_v28 = vadd.f32 %v1345_v24, %v2276_v21  ;;  %v1347_v31 = vmul.f32 %v2085_v25, %v2274_v19  ;;  %v2087_v32 = vpop.eup %2086 }
 0xdca   :  { %v2089_v10 = vpop.eup %2088  ;;  %v1360_v26 = vmul.f32 %v2087_v32, %v1355_v14  ;;  %v1540_v14 = vld [vmem:[%s2816_s5 + $0x20] sm:$0xff] }
 0xdcb   :  { %v1362_v34 = vmul.f32 %v2087_v32, %v1349_v28  ;;  %v1351_v43 = vadd.f32 %v1347_v31, %v2276_v21  ;;  %v1361_v39 = vmul.f32 %v2089_v10, %v1357_v35  ;;  %v1541_v35 = vld [vmem:[%s2816_s5 + $0x28] sm:$0xff] }
 0xdcd   :  { %1366 = vrot.lane.b32.xlu1 %v1362_v34, %s2157_s1  ;;  %v1363_v11 = vmul.f32 %v2089_v10, %v1351_v43  ;;  %v1536_v34 = vld [vmem:[%s2816_s5] sm:$0xff] }
 0xdcf   :  { %1368 = vrot.lane.b32.xlu0 %v1363_v11, %s2157_s1 }
 0xe3f   :  { %v1367_v36 = vpop.permute.xlu1 %1366 }
 0xe40   :  { %v1372_v38 = vadd.f32 %v1367_v36, %v1360_v26  ;;  %v1906_v26 = vpack.c.bf16 %v1541_v35, %v1540_v14  ;;  %v1542_v36 = vld [vmem:[%s2816_s5 + $0x30] sm:$0xff] }
 0xe41   :  { %v1369_v41 = vpop.permute.xlu0 %1368 }
 0xe42   :  { %2090 = vtanh.f32 %v1372_v38  ;;  %v1373_v45 = vadd.f32 %v1369_v41, %v1361_v39 }
 0xe44   :  { %2092 = vtanh.f32 %v1373_v45 }
 0xe4c   :  { %v2091_v30 = vpop.eup %2090 }
 0xe4d   :  { %v1376_v33 = vmul.f32 %v2091_v30, %v1349_v28 }
 0xe4e   :  { %v2093_v9 = vpop.eup %2092 }
 0xe4f   :  { %1386 = vrot.lane.b32.xlu1 %v1376_v33, %s2157_s1  ;;  %v1377_v42 = vmul.f32 %v2093_v9, %v1351_v43  ;;  %v1537_v43 = vld [vmem:[%s2816_s5 + $0x8] sm:$0xff] }
 0xe50   :  { %v1898_v10 = vpack.c.bf16 %v1537_v43, %v1536_v34 }
 0xe51   :  { %1388 = vrot.lane.b32.xlu0 %v1377_v42, %s2157_s1 }
 0xe52   :  { %1899 = vmatprep.subr.bf16.mxu0 %v1898_v10 }
 0xe53   :  { %1396 = vrot.lane.b32.xlu1 %v1372_v38, %s2157_s1  ;;  %1901 = vmatpush3.bf16.msra.mxu0 %v1898_v10  ;;  %v1543_v38 = vld [vmem:[%s2816_s5 + $0x38] sm:$0xff] }
 0xe54   :  { %v1910_v39 = vpack.c.bf16 %v1543_v38, %v1542_v36 }
 0xe55   :  { %1398 = vrot.lane.b32.xlu0 %v1373_v45, %s2157_s1 }
 0xec1   :  { %v1387_v48 = vpop.permute.xlu1 %1386 }
 0xec2   :  { %v2720_v61 = vsel %vm1382_vm14, %v1387_v48, %v2685_v40 }
 0xec3   :  { %v1389_v57 = vpop.permute.xlu0 %1388 }
 0xec4   :  { %v2725_v47 = vsel %vm2452_vm10, %v1389_v57, %v2690_v29  ;;  %v1406_v29 = vld [vmem:[#allocation2 + $0xe8] sm:$0xff] }
 0xec5   :  { %v1409_v27 = vpack.c.bf16 %v2725_v47, %v2720_v61  ;;  %v1397_v0 = vpop.permute.xlu1 %1396 }
 0xec6   :  { %v1402_v1 = vsel %vm1382_vm14, %v1397_v0, %v2695_v50 }
 0xec7   :  { %1494 = vrot.lane.b32.xlu1 %v1402_v1, %s2157_s1  ;;  %1848 = vmatmul.mubr.msk.bf16.vlgmr.msra.gmra.mrb[20].mxu1 %vm437_vm6, %v1409_v27  ;;  %v1399_v49 = vpop.permute.xlu0 %1398 }
 0xec8   :  { %v1403_v40 = vsel %vm2452_vm10, %v1399_v49, %v2703_v62  ;;  %vm1518_vm10 = vcmp.le.s32.totalorder %v2466_v4, 7  ;;  %v1634_v4 = vld [vmem:[%s2818_s7] sm:$0xff]  ;;  %s1758_s7 = sshll.u32 %s2158_s6, 4  ;;  %s1759_s7 = int_to_ptr.vmem [resolvable:$true] %s1758_s7 }
 0xec9   :  { %1496 = vrot.lane.b32.xlu0 %v1403_v40, %s2157_s1  ;;  %vm1522_vm12 = vmand %vm1518_vm10, %vm1520_vm15  ;;  %p2127_p2 = scmp.lt.s32.totalorder %s1759_s7, %s1759_s7 }
 0xf39   :  { %v1495_v41 = vpop.permute.xlu1 %1494 }
 0xf3b   :  { %v1497_v45 = vpop.permute.xlu0 %1496 }
 0xf9a   :  { %v1447_v46 = vpop.f32.mrb[20].mxu1 }
 0xf9b   :  { %v1456_v59 = vadd.f32 %v1447_v46, %v1405_v63  ;;  %v1449_v3 = vpop.f32.mrb[21].mxu1 }
 0xf9c   :  { %v1457_v37 = vadd.f32 %v1449_v3, %v1406_v29  ;;  %v1451_v50 = vpop.f32.mrb[22].mxu1 }
 0xf9d   :  { %v1849_v6 = vmul.f32 -1.442695, %v1456_v59  ;;  %v1458_v7 = vadd.f32 %v1451_v50, %v1407_v51  ;;  %v1453_v8 = vpop.f32.mrb[23].mxu1 }
 0xf9e   :  { %v1850_v16 = vmul.f32 -1.442695, %v1457_v37  ;;  %v1459_v12 = vadd.f32 %v1453_v8, %v1408_v2  ;;  %v1856_v2 = vld [vmem:[%s2819_s8] ss:$0 sm:$0xff]  ;;  %s2122_s8 = scalar_lea.vmem %s1759_s7, 256 }
 0xf9f   :  { %2094 = vpow2.f32 %v1849_v6  ;;  %v1851_v17 = vmul.f32 -1.442695, %v1458_v7  ;;  %p2123_p1 = scmp.ne.s32.totalorder %s1759_s7, %s2122_s8  ;;  %p2128_p3 = scmp.lt.s32.totalorder %s2122_s8, %s2122_s8 }
 0xfa0   :  { %2096 = vpow2.f32 %v1850_v16  ;;  %v1852_v58 = vmul.f32 -1.442695, %v1459_v12 }
 0xfa1   :  { %2098 = vpow2.f32 %v1851_v17  ;;  %p2129_p4 = por %p2128_p3, %p2127_p2 }
 0xfa2   :  { %2100 = vpow2.f32 %v1852_v58 }
 0xfa3   :  { %p2130_p5 = pnand %p2129_p4, %p2123_p1 }
 0xfa9   :  { %v2095_v62 = vpop.eup %2094 }
 0xfaa   :  { %v2097_v13 = vpop.eup %2096  ;;  %v1472_v53 = vadd.f32 1.0, %v2095_v62 }
 0xfab   :  { %v2099_v56 = vpop.eup %2098  ;;  %v1473_v44 = vadd.f32 1.0, %v2097_v13 }
 0xfac   :  { %v2101_v52 = vpop.eup %2100  ;;  %v1474_v55 = vadd.f32 1.0, %v2099_v56 }
 0xfad   :  { %2102 = vrcp.f32 %v1473_v44  ;;  %v1475_v54 = vadd.f32 1.0, %v2101_v52 }
 0xfaf   :  { %2104 = vrcp.f32 %v1475_v54 }
 0xfb0   :  { %2106 = vrcp.f32 %v1472_v53 }
 0xfb1   :  { %2108 = vrcp.f32 %v1474_v55 }
 0xfb7   :  { %v2103_v15 = vpop.eup %2102 }
 0xfb8   :  { %v1485_v18 = vmul.f32 %v2103_v15, %v2274_v19 }
 0xfb9   :  { %v2105_v20 = vpop.eup %2104 }
 0xfba   :  { %v1489_v22 = vadd.f32 %v1485_v18, %v2276_v21  ;;  %v1487_v23 = vmul.f32 %v2105_v20, %v2274_v19  ;;  %v2107_v24 = vpop.eup %2106  ;;  %v1538_v19 = vld [vmem:[%s2816_s5 + $0x10] sm:$0xff] }
 0xfbb   :  { %v2109_v31 = vpop.eup %2108  ;;  %v1500_v30 = vmul.f32 %v2107_v24, %v1495_v41 }
 0xfbc   :  { %v1502_v25 = vmul.f32 %v2107_v24, %v1489_v22  ;;  %v1491_v28 = vadd.f32 %v1487_v23, %v2276_v21  ;;  %v1539_v21 = vld [vmem:[%s2816_s5 + $0x18] sm:$0xff]  ;;  %v1501_v42 = vmul.f32 %v2109_v31, %v1497_v45 }
 0xfbd   :  { %v1902_v11 = vpack.c.bf16 %v1539_v21, %v1538_v19 }
 0xfbe   :  { %1506 = vrot.lane.b32.xlu1 %v1502_v25, %s2157_s1  ;;  %v1503_v32 = vmul.f32 %v2109_v31, %v1491_v28 }
 0xfbf   :  { %1903 = vmatprep.subr.bf16.mxu0 %v1902_v11 }
 0xfc0   :  { %1508 = vrot.lane.b32.xlu0 %v1503_v32, %s2157_s1  ;;  %1905 = vmatpush3.bf16.msra.mxu0 %v1902_v11 }
 0xfc1   :  { %1907 = vmatprep.subr.bf16.mxu0 %v1906_v26 }
 0xfc4   :  { %1909 = vmatpush3.bf16.msra.mxu0 %v1906_v26 }
 0xfc5   :  { %1911 = vmatprep.subr.bf16.mxu0 %v1910_v39 }
 0xfc8   :  { %1913 = vmatpush3.bf16.msra.mxu0 %v1910_v39 }
 0xfc9   :  { %1893 = vmatprep.subr.mxu0 %v1634_v4 }
0x1030   :  { %v1507_v33 = vpop.permute.xlu1 %1506 }
0x1031   :  { %v1512_v9 = vadd.f32 %v1507_v33, %v1500_v30 }
0x1032   :  { %v1509_v48 = vpop.permute.xlu0 %1508 }
0x1033   :  { %2110 = vtanh.f32 %v1512_v9  ;;  %v1513_v57 = vadd.f32 %v1509_v48, %v1501_v42 }
0x1035   :  { %2112 = vtanh.f32 %v1513_v57 }
0x103d   :  { %v2111_v27 = vpop.eup %2110 }
0x103e   :  { %v1516_v0 = vmul.f32 %v2111_v27, %v1489_v22 }
0x103f   :  { %v2113_v1 = vpop.eup %2112 }
0x1040   :  { %1526 = vrot.lane.b32.xlu1 %v1516_v0, %s2157_s1  ;;  %v1517_v49 = vmul.f32 %v2113_v1, %v1491_v28 }
0x1042   :  { %1528 = vrot.lane.b32.xlu0 %v1517_v49, %s2157_s1 }
0x10b2   :  { %v1527_v40 = vpop.permute.xlu1 %1526 }
0x10b3   :  { %v1532_v63 = vsel %vm1522_vm12, %v1527_v40, %v2720_v61 }
0x10b4   :  { %1534 = vst.msk [vmem:[#allocation3] sm:$0xff] %vm437_vm6, %v1532_v63  ;;  %1890 = vmatprep.mubr.msk.f32.mxu0 %vm437_vm6, %v1532_v63  ;;  %v1529_v29 = vpop.permute.xlu0 %1528 }
0x10b5   :  { %v1533_v46 = vsel %vm2456_vm11, %v1529_v29, %v2725_v47  ;;  %vm1724_vm11 = vcmask 15360  }
0x10b6   :  { %1535 = vst.msk [vmem:[#allocation3 + $0x8] sm:$0xff] %vm437_vm6, %v1533_v46  ;;  %1891 = vmatmul.mubr.msk.f32.vlgmr.msra.gmra.mrb[40].mxu0 %vm437_vm6, %v1533_v46 }
0x10b7   :  { %1894 = vmatpush3.msra.mxu0 %v1634_v4 }
0x1189   :  { %v1892_v61 = vpop.f32.mrb[40].mxu0 }
0x118a   :  { %v1629_v51 = vadd.f32 %v1892_v61, %v1853_v5  ;;  %v1623_v59 = vpop.f32.mrb[41].mxu0 }
0x118b   :  { %v1624_v3 = vadd.f32 %v1853_v5, %v1623_v59 }
0x118c   :  { %v1633_v47 = vmax.f32 %v1629_v51, 0.0 }
0x118d   :  { %v1632_v60 = vmax.f32 %v1624_v3, 0.0 }
0x118f   :  { %1895 = vmatprep.mubr.msk.f32.mxu0 %vm1642_vm1, %v1632_v60 }
0x1190   :  { %1896 = vmatmul.mubr.msk.f32.vlgmr.msra.gmra.mrb[42].mxu0 %vm1642_vm1, %v1633_v47 }
0x1263   :  { %v1897_v37 = vpop.f32.mrb[42].mxu0 }
0x1264   :  { %v1721_v50 = vadd.f32 %v1897_v37, %v1856_v2  ;;  %v1715_v6 = vpop.f32.mrb[43].mxu0 }
0x1265   :  { %v1716_v7 = vadd.f32 %v1856_v2, %v1715_v6 }
0x1266   :  { %v1728_v8 = vsel %vm1724_vm11, %v1721_v50, -inf }
0x1267   :  { %1729 = vmax.xlane.f32.xlu0 %v1728_v8  ;;  %v1725_v16 = vsel %vm1724_vm11, %v1716_v7, -inf }
0x1268   :  { %1726 = vmax.xlane.f32.xlu1 %v1725_v16 }
0x12f4   :  { %v1730_v12 = vpop.xlane.xlu0 %1729 }
0x12f5   :  { %v1732_v17 = vsub.f32 %v1721_v50, %v1730_v12  ;;  %v1727_v58 = vpop.xlane.xlu1 %1726 }
0x12f6   :  { %v1731_v62 = vsub.f32 %v1716_v7, %v1727_v58 }
0x12f7   :  { %v1735_v13 = vmul.f32 1.442695, %v1732_v17 }
0x12f8   :  { %v1733_v56 = vmul.f32 1.442695, %v1731_v62 }
0x12f9   :  { %2114 = vpow2.f32 %v1735_v13 }
0x12fa   :  { %2116 = vpow2.f32 %v1733_v56 }
0x1303   :  { %v2115_v44 = vpop.eup %2114 }
0x1304   :  { %v2117_v52 = vpop.eup %2116  ;;  %v1740_v53 = vsel %vm1724_vm11, %v2115_v44, 0.0 }
0x1305   :  { %1741 = vadd.xlane.f32.xlu1 %v1740_v53  ;;  %v1737_v54 = vsel %vm1724_vm11, %v2117_v52, 0.0 }
0x1306   :  { %1738 = vadd.xlane.f32.xlu0 %v1737_v54 }
0x1307   :  { %2133 = shalt.err (!%p2130_p5)
}
0x1308   :  { %s2134_s13 = scalar_lea.hbm %s2820_s9, 256 }
0x1309   :  { %p2135_p6 = scmp.ne.s32.totalorder %s2820_s9, %s2134_s13  ;;  %p2138_p7 = scmp.lt.u32.totalorder %s2134_s13, %s2820_s9 }
0x130b   :  { %p2140_p8 = pnand %p2138_p7, %p2135_p6 }
0x130d   :  { %2143 = shalt.err (!%p2140_p8)
}
0x130e   :  { %s2159_s17 = smov 128   ;;  %s2160_s18 = smov 8  }
0x130f   :  { %1764 = dma.vmem_to_hbm [thread:$0]  %s1759_s7, 256, %s2820_s9, [#allocation4], %s2159_s17, %s2159_s17, %s2160_s18  }
0x1392   :  { %v1742_v55 = vpop.xlane.xlu1 %1741 }
0x1393   :  { %2118 = vlog2.f32 %v1742_v55  ;;  %v1739_v15 = vpop.xlane.xlu0 %1738 }
0x1394   :  { %2120 = vlog2.f32 %v1739_v15 }
0x139d   :  { %v2119_v18 = vpop.eup %2118 }
0x139e   :  { %v2121_v20 = vpop.eup %2120  ;;  %v1746_v22 = vmul.f32 0.6931472, %v2119_v18 }
0x139f   :  { %v1744_v23 = vmul.f32 0.6931472, %v2121_v20 }
0x13a0   :  { %v1748_v24 = vadd.f32 %v1746_v22, %v1730_v12 }
0x13a1   :  { %v1747_v25 = vadd.f32 %v1744_v23, %v1727_v58 }
0x13a2   :  { %v1750_v28 = vsub.f32 %v1721_v50, %v1748_v24 }
0x13a3   :  { %v1749_v31 = vsub.f32 %v1716_v7, %v1747_v25 }
0x13a4   :  { %1752 = vst.msk [vmem:[%s2821_s10 + $0x8] sm:$0xff] %vm1724_vm11, %v1750_v28 }
0x13a5   :  { %1751 = vst.msk [vmem:[%s2821_s10] sm:$0xff] %vm1724_vm11, %v1749_v31 }
0x13a6   :  { %2148 = dma.done.wait [#allocation4], 256  }
0x13a7   :  { %2149 = vsyncadd [#allocation4], 4294967040 }
0x13a8   :  { %1772 = vsyncpa [#allocation4], 1 }

</bundles_post_ra>
